<compile_context>
chip_gen: v7x
topology: tpu7x:2x2x1
jax: 0.10.0
libtpu: 0.0.40
codegen_flags: <defaults>
</compile_context>

<pallas_src>
import functools

import jax
import jax.numpy as jnp
from jax.experimental import pallas as pl
from jax.experimental.pallas import tpu as pltpu

LN_EPS = 1e-5     # torch.nn.LayerNorm default eps
GEN_EPS = 1e-7    # GENConv message eps
LANE = 128
EBLK = 8          # edge sublane block for the running segment max


def _round_up(v, m):
    return ((v + m - 1) // m) * m


def _vmem():
    return pl.BlockSpec(memory_space=pltpu.MemorySpace.VMEM)


def _smem():
    return pl.BlockSpec(memory_space=pltpu.MemorySpace.SMEM)


# --------------------------------------------------------------------------- #
# Fused Pallas kernel: whole DeeperGCN forward
# --------------------------------------------------------------------------- #
def _deeper_gcn_kernel(
    x_ref, eattr_ref, src_ref, dst_ref, dstT_ref,
    nw_ref, nb_ref, ew_ref, eb_ref,
    pg_ref, pb_ref, t_ref,
    w1_ref, b1_ref, g1_ref, bt1_ref, w2_ref, b2_ref,
    o_ref,
    logits_s, dstneg_s,
    *, num_layers: int, d_real: int, h_real: int, eblk: int,
):
    f32 = jnp.float32
    n_nodes = x_ref.shape[0]
    e_edges = src_ref.shape[0]          # already padded to a multiple of eblk
    d_pad = nw_ref.shape[1]             # padded hidden (lane-dense, multiple of 128)
    h_pad = w1_ref.shape[2]             # padded MLP hidden (lane-dense)
    n_eblk = e_edges // eblk

    # ---- lane masks so LayerNorm stats only see the real channels ------------
    lane_d = jax.lax.broadcasted_iota(jnp.int32, (1, d_pad), 1)
    mask_d = (lane_d < d_real).astype(f32)
    lane_h = jax.lax.broadcasted_iota(jnp.int32, (1, h_pad), 1)
    mask_h = (lane_h < h_real).astype(f32)
    inv_d = f32(1.0 / d_real)
    inv_h = f32(1.0 / h_real)

    def masked_ln(v, gamma, beta, mask, inv_n):
        # Single masked pass: var = E[x^2] - mu^2. Padded lanes of the output are
        # zeroed by gamma/beta (zero-padded), no extra mask multiply on the out path.
        vm = v * mask
        mu = jnp.sum(vm, axis=-1, keepdims=True) * inv_n
        ex2 = jnp.sum(vm * v, axis=-1, keepdims=True) * inv_n
        var = ex2 - mu * mu
        return (v - mu) * jax.lax.rsqrt(var + LN_EPS) * gamma + beta

    # ---- gather / scatter masks built in-register from edge indices ----------
    ids_en = jax.lax.broadcasted_iota(jnp.int32, (e_edges, n_nodes), 1)   # [E, N]
    src_oh = (ids_en == src_ref[...]).astype(f32)                         # [E, N]
    dst_oh = (ids_en == dst_ref[...]).astype(f32)                         # [E, N]
    ids_ne = jax.lax.broadcasted_iota(jnp.int32, (n_nodes, e_edges), 0)   # [N, E]
    dst_ohT = (ids_ne == dstT_ref[...]).astype(f32)                       # [N, E]
    # Layer-invariant additive segment mask: 0 for members, -1e30 otherwise.
    # Kept in VMEM scratch so the blocked seg-max loop can slice it per edge block.
    dstneg_s[...] = (dst_oh - 1.0) * f32(1e30)                            # [E, N]

    # ---- encoders -------------------------------------------------------------
    h = jnp.dot(x_ref[...], nw_ref[...], preferred_element_type=f32) + nb_ref[...]
    ea = jnp.dot(eattr_ref[...], ew_ref[...], preferred_element_type=f32) + eb_ref[...]

    def gen_conv(hin, i):
        t = t_ref[i]                                                      # SMEM scalar
        # message: relu(x_src + edge_attr) + eps
        x_j = jnp.dot(src_oh, hin, preferred_element_type=f32)            # [E, Dp] gather
        msg = jnp.maximum(x_j + ea, 0.0) + GEN_EPS
        logits = msg * t

        # ---- exact per-destination max via blocked running max ---------------
        # (no [E, N, Dp] cube: working set = one edge block + the [N, Dp] carry)
        logits_s[...] = logits

        def seg_body(eb, carry):
            lo = pl.multiple_of(eb * eblk, eblk)
            lg = logits_s[pl.ds(lo, eblk), :]                             # [eblk, Dp]
            dn = dstneg_s[pl.ds(lo, eblk), :]                             # [eblk, N]
            blk = lg[:, None, :] + dn[:, :, None]                         # [eblk, N, Dp]
            return jnp.maximum(carry, jnp.max(blk, axis=0))

        seg_max = jax.lax.fori_loop(
            0, n_eblk, seg_body,
            jnp.full((n_nodes, d_pad), -1e30, dtype=f32))                 # [N, Dp]

        shift = jnp.dot(dst_oh, seg_max, preferred_element_type=f32)      # [E, Dp]
        w = jnp.exp(logits - shift)

        # ---- fused denom/num scatter: one [N,E] x [E,2*Dp] matmul -------------
        rhs = jnp.concatenate([w, msg * w], axis=1)                       # [E, 2*Dp]
        both = jnp.dot(dst_ohT, rhs, preferred_element_type=f32)          # [N, 2*Dp]
        denom = both[:, :d_pad]
        num = both[:, d_pad:]
        safe = jnp.maximum(denom, f32(1e-30))
        inv = pl.reciprocal(safe, approx=True)                            # EUP
        inv = inv * (2.0 - safe * inv)                                    # 1 Newton step
        aggr = num * inv                                                  # 0 for isolated nodes

        out = aggr + hin                                                  # GENConv residual

        # GENConv MLP: Linear(D, 2D) -> LayerNorm(2D) -> ReLU -> Linear(2D, D)
        y = jnp.dot(out, w1_ref[i], preferred_element_type=f32) + b1_ref[i]
        y = jnp.maximum(masked_ln(y, g1_ref[i], bt1_ref[i], mask_h, inv_h), 0.0)
        return jnp.dot(y, w2_ref[i], preferred_element_type=f32) + b2_ref[i]

    # layers[0]: conv only (no pre-norm, no residual in the reference forward)
    h = gen_conv(h, 0)

    # layers[1:]: DeepGCNLayer 'res+'  ->  x = x + conv(dropout(relu(norm(x))))
    def layer_body(i, hc):
        g = jnp.maximum(masked_ln(hc, pg_ref[i], pb_ref[i], mask_d, inv_d), 0.0)
        # TODO(synk): dropout(p=0.1) inside the res+ block is identity in eval mode.
        return hc + gen_conv(g, i)

    h = jax.lax.fori_loop(1, num_layers, layer_body, h)

    # final: layers[0].act(layers[0].norm(x)); F.dropout is identity in eval mode.
    o_ref[...] = jnp.maximum(masked_ln(h, pg_ref[0], pb_ref[0], mask_d, inv_d), 0.0)


# --------------------------------------------------------------------------- #
# Parameter packing (zero-pad channels to lane-dense 128 multiples, stack layers)
# --------------------------------------------------------------------------- #
def _pad2(a, rows, cols):
    r, c = a.shape
    return jnp.pad(a, ((0, rows - r), (0, cols - c)))


def pack_params(params, hidden):
    d_pad = max(LANE, _round_up(hidden, LANE))
    h_pad = max(LANE, _round_up(2 * hidden, LANE))
    layers = params["layers"]
    packed = dict(
        node_w=_pad2(params["node_w"], params["node_w"].shape[0], d_pad),
        node_b=_pad2(params["node_b"], 1, d_pad),
        edge_w=_pad2(params["edge_w"], params["edge_w"].shape[0], d_pad),
        edge_b=_pad2(params["edge_b"], 1, d_pad),
        pre_g=jnp.stack([_pad2(l["pre_gamma"], 1, d_pad) for l in layers]),
        pre_b=jnp.stack([_pad2(l["pre_beta"], 1, d_pad) for l in layers]),
        t=jnp.stack([l["t"][0] for l in layers]),                       # [L] f32 (SMEM)
        w1=jnp.stack([_pad2(l["w1"], d_pad, h_pad) for l in layers]),
        b1=jnp.stack([_pad2(l["b1"], 1, h_pad) for l in layers]),
        ln_g=jnp.stack([_pad2(l["ln_gamma"], 1, h_pad) for l in layers]),
        ln_b=jnp.stack([_pad2(l["ln_beta"], 1, h_pad) for l in layers]),
        w2=jnp.stack([_pad2(l["w2"], h_pad, d_pad) for l in layers]),
        b2=jnp.stack([_pad2(l["b2"], 1, d_pad) for l in layers]),
    )
    return packed, d_pad, h_pad


# --------------------------------------------------------------------------- #
# Wrapper: single fused pallas_call for the whole forward
# --------------------------------------------------------------------------- #
def deeper_gcn_forward(params, x, edge_index, edge_attr):
    n = x.shape[0]
    e = edge_attr.shape[0]
    hidden = params["node_w"].shape[1]
    num_layers = len(params["layers"])
    p, d_pad, h_pad = pack_params(params, hidden)

    # Pad the edge dimension to a multiple of the seg-max block; padded edges get
    # dst = n (out of range) so their one-hot rows/columns are all-zero -> no-ops.
    e_pad = _round_up(e, EBLK)
    src = edge_index[0].astype(jnp.int32)
    dst = edge_index[1].astype(jnp.int32)
    ea = edge_attr
    if e_pad != e:
        src = jnp.concatenate([src, jnp.zeros((e_pad - e,), jnp.int32)])
        dst = jnp.concatenate([dst, jnp.full((e_pad - e,), n, jnp.int32)])
        ea = jnp.pad(ea, ((0, e_pad - e), (0, 0)))
    src_idx = src.reshape(e_pad, 1)     # [E, 1]
    dst_idx = dst.reshape(e_pad, 1)     # [E, 1]
    dst_row = dst.reshape(1, e_pad)     # [1, E]

    kernel = functools.partial(
        _deeper_gcn_kernel,
        num_layers=num_layers, d_real=hidden, h_real=2 * hidden, eblk=EBLK)

    args = (
        x, ea, src_idx, dst_idx, dst_row,
        p["node_w"], p["node_b"], p["edge_w"], p["edge_b"],
        p["pre_g"], p["pre_b"], p["t"],
        p["w1"], p["b1"], p["ln_g"], p["ln_b"], p["w2"], p["b2"],
    )
    in_specs = [_vmem()] * 11 + [_smem()] + [_vmem()] * 6

    # Per-generation VMEM budget: ~3/4 of physical, capped at 100 MiB
    # (v7x: ~48 MiB of 64 MiB; v5e/v6e: ~96 MiB of 128 MiB).
    try:
        vmem_cap = int(pltpu.get_tpu_info().vmem_capacity_bytes)
    except Exception:
        vmem_cap = 64 * 1024 * 1024
    vmem_limit = min((vmem_cap * 3) // 4, 100 * 1024 * 1024)

    # Advisory cost estimate so XLA can schedule around the fused custom call.
    flops = (2 * n * x.shape[1] * d_pad + 2 * e_pad * ea.shape[1] * d_pad
             + num_layers * (10 * e_pad * n * d_pad + 4 * n * d_pad * h_pad))
    transcendentals = num_layers * (e_pad * d_pad + 3 * n * d_pad)
    bytes_accessed = sum(int(a.size) * 4 for a in args) + n * d_pad * 4

    out = pl.pallas_call(
        kernel,
        out_shape=jax.ShapeDtypeStruct((n, d_pad), jnp.float32),
        in_specs=in_specs,
        out_specs=_vmem(),
        scratch_shapes=[
            pltpu.VMEM((e_pad, d_pad), jnp.float32),   # per-layer logits staging
            pltpu.VMEM((e_pad, n), jnp.float32),       # additive segment mask
        ],
        compiler_params=pltpu.CompilerParams(vmem_limit_bytes=int(vmem_limit)),
        cost_estimate=pl.CostEstimate(
            flops=int(flops),
            transcendentals=int(transcendentals),
            bytes_accessed=int(bytes_accessed)),
    )(*args)
    return out[:, :hidden]        # drop padded lanes (layout plumbing only)


# --------------------------------------------------------------------------- #
# Pure-JAX reference (for the correctness check)
# --------------------------------------------------------------------------- #
def reference_forward(params, x, edge_index, edge_attr):
    hi = jax.lax.Precision.HIGHEST
    lin = lambda a, w, b: jnp.dot(a, w, precision=hi) + b

    def ln(a, g, b):
        mu = a.mean(-1, keepdims=True)
        var = ((a - mu) ** 2).mean(-1, keepdims=True)
        return (a - mu) / jnp.sqrt(var + LN_EPS) * g + b

    n = x.shape[0]
    src, dst = edge_index[0], edge_index[1]
    h = lin(x, params["node_w"], params["node_b"])
    ea = lin(edge_attr, params["edge_w"], params["edge_b"])

    def conv(hh, lp):
        msg = jnp.maximum(hh[src] + ea, 0.0) + GEN_EPS
        logits = msg * lp["t"][0]
        smax = jax.ops.segment_max(logits, dst, num_segments=n)
        smax = jnp.where(jnp.isfinite(smax), smax, 0.0)
        w = jnp.exp(logits - smax[dst])
        denom = jax.ops.segment_sum(w, dst, num_segments=n)
        alpha = w / jnp.where(denom[dst] > 0, denom[dst], 1.0)
        aggr = jax.ops.segment_sum(msg * alpha, dst, num_segments=n)
        out = aggr + hh
        y = lin(out, lp["w1"], lp["b1"])
        y = jnp.maximum(ln(y, lp["ln_gamma"], lp["ln_beta"]), 0.0)
        return lin(y, lp["w2"], lp["b2"])

    h = conv(h, params["layers"][0])
    for lp in params["layers"][1:]:
        g = jnp.maximum(ln(h, lp["pre_gamma"], lp["pre_beta"]), 0.0)
        h = h + conv(g, lp)
    h = jnp.maximum(
        ln(h, params["layers"][0]["pre_gamma"], params["layers"][0]["pre_beta"]), 0.0
    )
    return h


# --------------------------------------------------------------------------- #
# Deterministic parameter init (PyTorch Linear-style uniform init)
# --------------------------------------------------------------------------- #
def _init_linear(key, fan_in, fan_out):
    k1, k2 = jax.random.split(key)
    bound = 1.0 / float(fan_in) ** 0.5
    w = jax.random.uniform(k1, (fan_in, fan_out), jnp.float32, -bound, bound)
    b = jax.random.uniform(k2, (1, fan_out), jnp.float32, -bound, bound)
    return w, b


def init_params(key, data_channels, edge_channels, hidden, num_layers):
    keys = jax.random.split(key, 2 + num_layers)
    node_w, node_b = _init_linear(keys[0], data_channels, hidden)
    edge_w, edge_b = _init_linear(keys[1], edge_channels, hidden)
    layers = []
    for i in range(num_layers):
        k1, k2 = jax.random.split(keys[2 + i])
        w1, b1 = _init_linear(k1, hidden, 2 * hidden)
        w2, b2 = _init_linear(k2, 2 * hidden, hidden)
        layers.append(
            dict(
                t=jnp.ones((1,), jnp.float32),                     # learnable temperature
                w1=w1, b1=b1,
                ln_gamma=jnp.ones((1, 2 * hidden), jnp.float32),   # MLP LayerNorm
                ln_beta=jnp.zeros((1, 2 * hidden), jnp.float32),
                w2=w2, b2=b2,
                pre_gamma=jnp.ones((1, hidden), jnp.float32),      # DeepGCNLayer LayerNorm
                pre_beta=jnp.zeros((1, hidden), jnp.float32),
            )
        )
    return dict(node_w=node_w, node_b=node_b, edge_w=edge_w, edge_b=edge_b,
                layers=layers)


if __name__ == "__main__":
    N, E = 16, 48
    DATA_C, EDGE_C, HIDDEN, NUM_LAYERS = 8, 4, 32, 3

    key = jax.random.PRNGKey(0)
    kx, ke, ks, kd, kp = jax.random.split(key, 5)

    x = jax.random.normal(kx, (N, DATA_C), jnp.float32)
    edge_attr = jax.random.normal(ke, (E, EDGE_C), jnp.float32)
    # guarantee every node has at least one incoming edge, plus random extras
    dst = jnp.concatenate(
        [jnp.arange(N, dtype=jnp.int32),
         jax.random.randint(kd, (E - N,), 0, N, jnp.int32)]
    )
    src = jax.random.randint(ks, (E,), 0, N, jnp.int32)
    edge_index = jnp.stack([src, dst], axis=0)                      # [2, E]

    params = init_params(kp, DATA_C, EDGE_C, HIDDEN, NUM_LAYERS)

    out = jax.block_until_ready(deeper_gcn_forward(params, x, edge_index, edge_attr))
    ref = jax.block_until_ready(reference_forward(params, x, edge_index, edge_attr))

    assert out.shape == (N, HIDDEN) and out.dtype == jnp.float32
    assert jnp.all(jnp.isfinite(out))
    assert jnp.allclose(out, ref, rtol=2e-3, atol=2e-3), float(jnp.abs(out - ref).max())

    print("KERNEL_OK")
</pallas_src>

<mosaic_0001>
module attributes {stable_mosaic.version = 11 : i64} {
  func.func @_deeper_gcn_kernel(%arg0: memref<16x8xf32, #tpu.memory_space<vmem>>, %arg1: memref<48x4xf32, #tpu.memory_space<vmem>>, %arg2: memref<48x1xi32, #tpu.memory_space<vmem>>, %arg3: memref<48x1xi32, #tpu.memory_space<vmem>>, %arg4: memref<1x48xi32, #tpu.memory_space<vmem>>, %arg5: memref<8x128xf32, #tpu.memory_space<vmem>>, %arg6: memref<1x128xf32, #tpu.memory_space<vmem>>, %arg7: memref<4x128xf32, #tpu.memory_space<vmem>>, %arg8: memref<1x128xf32, #tpu.memory_space<vmem>>, %arg9: memref<3x1x128xf32, #tpu.memory_space<vmem>>, %arg10: memref<3x1x128xf32, #tpu.memory_space<vmem>>, %arg11: memref<3xf32, #tpu.memory_space<smem>>, %arg12: memref<3x128x128xf32, #tpu.memory_space<vmem>>, %arg13: memref<3x1x128xf32, #tpu.memory_space<vmem>>, %arg14: memref<3x1x128xf32, #tpu.memory_space<vmem>>, %arg15: memref<3x1x128xf32, #tpu.memory_space<vmem>>, %arg16: memref<3x128x128xf32, #tpu.memory_space<vmem>>, %arg17: memref<3x1x128xf32, #tpu.memory_space<vmem>>, %arg18: memref<16x128xf32, #tpu.memory_space<vmem>>, %arg19: memref<48x128xf32, #tpu.memory_space<vmem>>, %arg20: memref<48x16xf32, #tpu.memory_space<vmem>>) attributes {dimension_semantics = [], scalar_prefetch = 0 : i64, scratch_operands = 2 : i64, tpu.core_type = #tpu.core_type<tc>} {
    %0 = tpu.iota {dimensions = array<i32: 1>} : vector<1x128xi32>
    %c32_i32 = arith.constant 32 : i32
    %1 = vector.broadcast %c32_i32 : i32 to vector<1x128xi32>
    %2 = arith.cmpi slt, %0, %1 : vector<1x128xi32>
    %3 = arith.extui %2 : vector<1x128xi1> to vector<1x128xi32>
    %4 = arith.sitofp %3 : vector<1x128xi32> to vector<1x128xf32>
    %5 = tpu.iota {dimensions = array<i32: 1>} : vector<1x128xi32>
    %c64_i32 = arith.constant 64 : i32
    %6 = vector.broadcast %c64_i32 : i32 to vector<1x128xi32>
    %7 = arith.cmpi slt, %5, %6 : vector<1x128xi32>
    %8 = arith.extui %7 : vector<1x128xi1> to vector<1x128xi32>
    %9 = arith.sitofp %8 : vector<1x128xi32> to vector<1x128xf32>
    %10 = tpu.iota {dimensions = array<i32: 1>} : vector<48x16xi32>
    %c0 = arith.constant 0 : index
    %c0_0 = arith.constant 0 : index
    %11 = vector.load %arg2[%c0, %c0_0] : memref<48x1xi32, #tpu.memory_space<vmem>>, vector<48x1xi32>
    %12 = vector.broadcast %11 : vector<48x1xi32> to vector<48x16xi32>
    %13 = arith.cmpi eq, %10, %12 : vector<48x16xi32>
    %14 = arith.extui %13 : vector<48x16xi1> to vector<48x16xi32>
    %15 = arith.sitofp %14 : vector<48x16xi32> to vector<48x16xf32>
    %c0_1 = arith.constant 0 : index
    %c0_2 = arith.constant 0 : index
    %16 = vector.load %arg3[%c0_1, %c0_2] : memref<48x1xi32, #tpu.memory_space<vmem>>, vector<48x1xi32>
    %17 = vector.broadcast %16 : vector<48x1xi32> to vector<48x16xi32>
    %18 = arith.cmpi eq, %10, %17 : vector<48x16xi32>
    %19 = arith.extui %18 : vector<48x16xi1> to vector<48x16xi32>
    %20 = arith.sitofp %19 : vector<48x16xi32> to vector<48x16xf32>
    %21 = tpu.iota {dimensions = array<i32: 0>} : vector<16x48xi32>
    %c0_3 = arith.constant 0 : index
    %c0_4 = arith.constant 0 : index
    %22 = vector.load %arg4[%c0_3, %c0_4] : memref<1x48xi32, #tpu.memory_space<vmem>>, vector<1x48xi32>
    %23 = vector.broadcast %22 : vector<1x48xi32> to vector<16x48xi32>
    %24 = arith.cmpi eq, %21, %23 : vector<16x48xi32>
    %25 = arith.extui %24 : vector<16x48xi1> to vector<16x48xi32>
    %26 = arith.sitofp %25 : vector<16x48xi32> to vector<16x48xf32>
    %cst = arith.constant 1.000000e+00 : f32
    %27 = vector.broadcast %cst : f32 to vector<48x16xf32>
    %28 = arith.subf %20, %27 : vector<48x16xf32>
    %cst_5 = arith.constant 1.000000e+30 : f32
    %29 = vector.broadcast %cst_5 : f32 to vector<48x16xf32>
    %30 = arith.mulf %28, %29 : vector<48x16xf32>
    %c0_6 = arith.constant 0 : index
    %c0_7 = arith.constant 0 : index
    %31 = vector.load %arg20[%c0_6, %c0_7] : memref<48x16xf32, #tpu.memory_space<vmem>>, vector<48x16xf32>
    tpu.vector_store %arg20[%c0_6, %c0_7], %30 {strides = array<i32>} : memref<48x16xf32, #tpu.memory_space<vmem>>, vector<48x16xf32>,
    %c0_8 = arith.constant 0 : index
    %c0_9 = arith.constant 0 : index
    %32 = vector.load %arg0[%c0_8, %c0_9] : memref<16x8xf32, #tpu.memory_space<vmem>>, vector<16x8xf32>
    %c0_10 = arith.constant 0 : index
    %c0_11 = arith.constant 0 : index
    %33 = vector.load %arg5[%c0_10, %c0_11] : memref<8x128xf32, #tpu.memory_space<vmem>>, vector<8x128xf32>
    %cst_12 = arith.constant dense<0.000000e+00> : vector<16x128xf32>
    %34 = tpu.matmul %32, %33, %cst_12 {dimension_numbers = #tpu.dot_dimension_numbers<[1], [0], [0], [1], [0, 0, 1, 1], [], []>} : vector<16x8xf32>, vector<8x128xf32>, vector<16x128xf32> -> vector<16x128xf32>
    %c0_13 = arith.constant 0 : index
    %c0_14 = arith.constant 0 : index
    %35 = vector.load %arg6[%c0_13, %c0_14] : memref<1x128xf32, #tpu.memory_space<vmem>>, vector<1x128xf32>
    %36 = vector.broadcast %35 : vector<1x128xf32> to vector<16x128xf32>
    %37 = arith.addf %34, %36 : vector<16x128xf32>
    %c0_15 = arith.constant 0 : index
    %c0_16 = arith.constant 0 : index
    %38 = vector.load %arg1[%c0_15, %c0_16] : memref<48x4xf32, #tpu.memory_space<vmem>>, vector<48x4xf32>
    %c0_17 = arith.constant 0 : index
    %c0_18 = arith.constant 0 : index
    %39 = vector.load %arg7[%c0_17, %c0_18] : memref<4x128xf32, #tpu.memory_space<vmem>>, vector<4x128xf32>
    %cst_19 = arith.constant dense<0.000000e+00> : vector<48x128xf32>
    %40 = tpu.matmul %38, %39, %cst_19 {dimension_numbers = #tpu.dot_dimension_numbers<[1], [0], [0], [1], [0, 0, 1, 1], [], []>} : vector<48x4xf32>, vector<4x128xf32>, vector<48x128xf32> -> vector<48x128xf32>
    %c0_20 = arith.constant 0 : index
    %c0_21 = arith.constant 0 : index
    %41 = vector.load %arg8[%c0_20, %c0_21] : memref<1x128xf32, #tpu.memory_space<vmem>>, vector<1x128xf32>
    %42 = vector.broadcast %41 : vector<1x128xf32> to vector<48x128xf32>
    %43 = arith.addf %40, %42 : vector<48x128xf32>
    %c0_22 = arith.constant 0 : index
    %44 = memref.load %arg11[%c0_22] : memref<3xf32, #tpu.memory_space<smem>>
    %cst_23 = arith.constant dense<0.000000e+00> : vector<48x128xf32>
    %45 = tpu.matmul %15, %37, %cst_23 {dimension_numbers = #tpu.dot_dimension_numbers<[1], [0], [0], [1], [0, 0, 1, 1], [], []>} : vector<48x16xf32>, vector<16x128xf32>, vector<48x128xf32> -> vector<48x128xf32>
    %46 = arith.addf %45, %43 : vector<48x128xf32>
    %cst_24 = arith.constant 0.000000e+00 : f32
    %47 = vector.broadcast %cst_24 : f32 to vector<48x128xf32>
    %48 = arith.maximumf %46, %47 : vector<48x128xf32>
    %cst_25 = arith.constant 1.000000e-07 : f32
    %49 = vector.broadcast %cst_25 : f32 to vector<48x128xf32>
    %50 = arith.addf %48, %49 : vector<48x128xf32>
    %51 = vector.broadcast %44 : f32 to vector<48x128xf32>
    %52 = arith.mulf %50, %51 : vector<48x128xf32>
    %c0_26 = arith.constant 0 : index
    %c0_27 = arith.constant 0 : index
    %53 = vector.load %arg19[%c0_26, %c0_27] : memref<48x128xf32, #tpu.memory_space<vmem>>, vector<48x128xf32>
    tpu.vector_store %arg19[%c0_26, %c0_27], %52 {strides = array<i32>} : memref<48x128xf32, #tpu.memory_space<vmem>>, vector<48x128xf32>,
    %cst_28 = arith.constant -1.000000e+30 : f32
    %54 = vector.broadcast %cst_28 : f32 to vector<16x128xf32>
    %c0_i32 = arith.constant 0 : i32
    %c6_i32 = arith.constant 6 : i32
    %55 = arith.addi %c0_i32, %c6_i32 : i32
    %c1_i32 = arith.constant 1 : i32
    %56 = scf.for %arg21 = %c0_i32 to %55 step %c1_i32 iter_args(%arg22 = %54) -> (vector<16x128xf32>)  : i32 {
      %c8_i32 = arith.constant 8 : i32
      %151 = arith.muli %arg21, %c8_i32 : i32
      %152 = tpu.assume_multiple %151, 8 : i32
      %153 = arith.index_cast %152 : i32 to index
      %c0_79 = arith.constant 0 : index
      %154 = vector.load %arg19[%153, %c0_79] : memref<48x128xf32, #tpu.memory_space<vmem>>, vector<8x128xf32>
      %155 = arith.index_cast %152 : i32 to index
      %c0_80 = arith.constant 0 : index
      %156 = vector.load %arg20[%155, %c0_80] : memref<48x16xf32, #tpu.memory_space<vmem>>, vector<8x16xf32>
      %157 = vector.shape_cast %154 : vector<8x128xf32> to vector<8x1x128xf32>
      %158 = vector.shape_cast %156 : vector<8x16xf32> to vector<8x16x1xf32>
      %159 = vector.broadcast %157 : vector<8x1x128xf32> to vector<8x16x128xf32>
      %160 = vector.broadcast %158 : vector<8x16x1xf32> to vector<8x16x128xf32>
      %161 = arith.addf %159, %160 : vector<8x16x128xf32>
      %cst_81 = arith.constant dense<0xFF800000> : vector<16x128xf32>
      %162 = vector.multi_reduction <maximumf>, %161, %cst_81 [0] : vector<8x16x128xf32> to vector<16x128xf32>
      %163 = arith.maximumf %arg22, %162 : vector<16x128xf32>
      scf.yield %163 : vector<16x128xf32>
    }
    %c6_i32_29 = arith.constant 6 : i32
    %cst_30 = arith.constant dense<0.000000e+00> : vector<48x128xf32>
    %57 = tpu.matmul %20, %56, %cst_30 {dimension_numbers = #tpu.dot_dimension_numbers<[1], [0], [0], [1], [0, 0, 1, 1], [], []>} : vector<48x16xf32>, vector<16x128xf32>, vector<48x128xf32> -> vector<48x128xf32>
    %58 = arith.subf %52, %57 : vector<48x128xf32>
    %59 = math.exp %58 : vector<48x128xf32>
    %60 = arith.mulf %50, %59 : vector<48x128xf32>
    %61 = tpu.concatenate %59, %60 in 1 : vector<48x128xf32>, vector<48x128xf32> -> vector<48x256xf32>
    %cst_31 = arith.constant dense<0.000000e+00> : vector<16x256xf32>
    %62 = tpu.matmul %26, %61, %cst_31 {dimension_numbers = #tpu.dot_dimension_numbers<[1], [0], [0], [1], [0, 0, 1, 1], [], []>} : vector<16x48xf32>, vector<48x256xf32>, vector<16x256xf32> -> vector<16x256xf32>
    %63 = vector.extract_strided_slice %62 {offsets = [0, 0], sizes = [16, 128], strides = [1, 1]} : vector<16x256xf32> to vector<16x128xf32>
    %64 = vector.extract_strided_slice %62 {offsets = [0, 128], sizes = [16, 128], strides = [1, 1]} : vector<16x256xf32> to vector<16x128xf32>
    %cst_32 = arith.constant 1.000000e-30 : f32
    %65 = vector.broadcast %cst_32 : f32 to vector<16x128xf32>
    %66 = arith.maximumf %63, %65 : vector<16x128xf32>
    %67 = tpu.reciprocal %66 {approx = true} : vector<16x128xf32> -> vector<16x128xf32>
    %68 = arith.mulf %66, %67 : vector<16x128xf32>
    %cst_33 = arith.constant 2.000000e+00 : f32
    %69 = vector.broadcast %cst_33 : f32 to vector<16x128xf32>
    %70 = arith.subf %69, %68 : vector<16x128xf32>
    %71 = arith.mulf %67, %70 : vector<16x128xf32>
    %72 = arith.mulf %64, %71 : vector<16x128xf32>
    %73 = arith.addf %72, %37 : vector<16x128xf32>
    %c0_34 = arith.constant 0 : index
    %c0_35 = arith.constant 0 : index
    %c0_36 = arith.constant 0 : index
    %74 = vector.load %arg12[%c0_34, %c0_35, %c0_36] : memref<3x128x128xf32, #tpu.memory_space<vmem>>, vector<1x128x128xf32>
    %75 = vector.shape_cast %74 : vector<1x128x128xf32> to vector<128x128xf32>
    %cst_37 = arith.constant dense<0.000000e+00> : vector<16x128xf32>
    %76 = tpu.matmul %73, %75, %cst_37 {dimension_numbers = #tpu.dot_dimension_numbers<[1], [0], [0], [1], [0, 0, 1, 1], [], []>} : vector<16x128xf32>, vector<128x128xf32>, vector<16x128xf32> -> vector<16x128xf32>
    %c0_38 = arith.constant 0 : index
    %c0_39 = arith.constant 0 : index
    %c0_40 = arith.constant 0 : index
    %77 = vector.load %arg13[%c0_38, %c0_39, %c0_40] : memref<3x1x128xf32, #tpu.memory_space<vmem>>, vector<1x1x128xf32>
    %78 = vector.shape_cast %77 : vector<1x1x128xf32> to vector<1x128xf32>
    %79 = vector.broadcast %78 : vector<1x128xf32> to vector<16x128xf32>
    %80 = arith.addf %76, %79 : vector<16x128xf32>
    %c0_41 = arith.constant 0 : index
    %c0_42 = arith.constant 0 : index
    %c0_43 = arith.constant 0 : index
    %81 = vector.load %arg14[%c0_41, %c0_42, %c0_43] : memref<3x1x128xf32, #tpu.memory_space<vmem>>, vector<1x1x128xf32>
    %82 = vector.shape_cast %81 : vector<1x1x128xf32> to vector<1x128xf32>
    %c0_44 = arith.constant 0 : index
    %c0_45 = arith.constant 0 : index
    %c0_46 = arith.constant 0 : index
    %83 = vector.load %arg15[%c0_44, %c0_45, %c0_46] : memref<3x1x128xf32, #tpu.memory_space<vmem>>, vector<1x1x128xf32>
    %84 = vector.shape_cast %83 : vector<1x1x128xf32> to vector<1x128xf32>
    %85 = vector.broadcast %9 : vector<1x128xf32> to vector<16x128xf32>
    %86 = arith.mulf %80, %85 : vector<16x128xf32>
    %cst_47 = arith.constant dense<0.000000e+00> : vector<16xf32>
    %87 = vector.multi_reduction <add>, %86, %cst_47 [1] : vector<16x128xf32> to vector<16xf32>
    %88 = vector.shape_cast %87 : vector<16xf32> to vector<16x1xf32>
    %cst_48 = arith.constant 1.562500e-02 : f32
    %89 = vector.broadcast %cst_48 : f32 to vector<16x1xf32>
    %90 = arith.mulf %88, %89 : vector<16x1xf32>
    %91 = arith.mulf %86, %80 : vector<16x128xf32>
    %cst_49 = arith.constant dense<0.000000e+00> : vector<16xf32>
    %92 = vector.multi_reduction <add>, %91, %cst_49 [1] : vector<16x128xf32> to vector<16xf32>
    %93 = vector.shape_cast %92 : vector<16xf32> to vector<16x1xf32>
    %cst_50 = arith.constant 1.562500e-02 : f32
    %94 = vector.broadcast %cst_50 : f32 to vector<16x1xf32>
    %95 = arith.mulf %93, %94 : vector<16x1xf32>
    %96 = arith.mulf %90, %90 : vector<16x1xf32>
    %97 = arith.subf %95, %96 : vector<16x1xf32>
    %98 = vector.broadcast %90 : vector<16x1xf32> to vector<16x128xf32>
    %99 = arith.subf %80, %98 : vector<16x128xf32>
    %cst_51 = arith.constant 9.99999974E-6 : f32
    %100 = vector.broadcast %cst_51 : f32 to vector<16x1xf32>
    %101 = arith.addf %97, %100 : vector<16x1xf32>
    %102 = math.rsqrt %101 : vector<16x1xf32>
    %103 = vector.broadcast %102 : vector<16x1xf32> to vector<16x128xf32>
    %104 = arith.mulf %99, %103 : vector<16x128xf32>
    %105 = vector.broadcast %82 : vector<1x128xf32> to vector<16x128xf32>
    %106 = arith.mulf %104, %105 : vector<16x128xf32>
    %107 = vector.broadcast %84 : vector<1x128xf32> to vector<16x128xf32>
    %108 = arith.addf %106, %107 : vector<16x128xf32>
    %cst_52 = arith.constant 0.000000e+00 : f32
    %109 = vector.broadcast %cst_52 : f32 to vector<16x128xf32>
    %110 = arith.maximumf %108, %109 : vector<16x128xf32>
    %c0_53 = arith.constant 0 : index
    %c0_54 = arith.constant 0 : index
    %c0_55 = arith.constant 0 : index
    %111 = vector.load %arg16[%c0_53, %c0_54, %c0_55] : memref<3x128x128xf32, #tpu.memory_space<vmem>>, vector<1x128x128xf32>
    %112 = vector.shape_cast %111 : vector<1x128x128xf32> to vector<128x128xf32>
    %cst_56 = arith.constant dense<0.000000e+00> : vector<16x128xf32>
    %113 = tpu.matmul %110, %112, %cst_56 {dimension_numbers = #tpu.dot_dimension_numbers<[1], [0], [0], [1], [0, 0, 1, 1], [], []>} : vector<16x128xf32>, vector<128x128xf32>, vector<16x128xf32> -> vector<16x128xf32>
    %c0_57 = arith.constant 0 : index
    %c0_58 = arith.constant 0 : index
    %c0_59 = arith.constant 0 : index
    %114 = vector.load %arg17[%c0_57, %c0_58, %c0_59] : memref<3x1x128xf32, #tpu.memory_space<vmem>>, vector<1x1x128xf32>
    %115 = vector.shape_cast %114 : vector<1x1x128xf32> to vector<1x128xf32>
    %116 = vector.broadcast %115 : vector<1x128xf32> to vector<16x128xf32>
    %117 = arith.addf %113, %116 : vector<16x128xf32>
    %cst_60 = arith.constant 3.125000e-02 : f32
    %cst_61 = arith.constant 1.562500e-02 : f32
    %c1_i32_62 = arith.constant 1 : i32
    %c2_i32 = arith.constant 2 : i32
    %118 = arith.addi %c1_i32_62, %c2_i32 : i32
    %c1_i32_63 = arith.constant 1 : i32
    %119 = scf.for %arg21 = %c1_i32_62 to %118 step %c1_i32_63 iter_args(%arg22 = %117) -> (vector<16x128xf32>)  : i32 {
      %151 = arith.index_cast %arg21 : i32 to index
      %c0_79 = arith.constant 0 : index
      %c0_80 = arith.constant 0 : index
      %152 = vector.load %arg9[%151, %c0_79, %c0_80] : memref<3x1x128xf32, #tpu.memory_space<vmem>>, vector<1x1x128xf32>
      %153 = vector.shape_cast %152 : vector<1x1x128xf32> to vector<1x128xf32>
      %154 = arith.index_cast %arg21 : i32 to index
      %c0_81 = arith.constant 0 : index
      %c0_82 = arith.constant 0 : index
      %155 = vector.load %arg10[%154, %c0_81, %c0_82] : memref<3x1x128xf32, #tpu.memory_space<vmem>>, vector<1x1x128xf32>
      %156 = vector.shape_cast %155 : vector<1x1x128xf32> to vector<1x128xf32>
      %157 = vector.broadcast %4 : vector<1x128xf32> to vector<16x128xf32>
      %158 = arith.mulf %arg22, %157 : vector<16x128xf32>
      %cst_83 = arith.constant dense<0.000000e+00> : vector<16xf32>
      %159 = vector.multi_reduction <add>, %158, %cst_83 [1] : vector<16x128xf32> to vector<16xf32>
      %160 = vector.shape_cast %159 : vector<16xf32> to vector<16x1xf32>
      %161 = vector.broadcast %cst_60 : f32 to vector<16x1xf32>
      %162 = arith.mulf %160, %161 : vector<16x1xf32>
      %163 = arith.mulf %158, %arg22 : vector<16x128xf32>
      %cst_84 = arith.constant dense<0.000000e+00> : vector<16xf32>
      %164 = vector.multi_reduction <add>, %163, %cst_84 [1] : vector<16x128xf32> to vector<16xf32>
      %165 = vector.shape_cast %164 : vector<16xf32> to vector<16x1xf32>
      %166 = vector.broadcast %cst_60 : f32 to vector<16x1xf32>
      %167 = arith.mulf %165, %166 : vector<16x1xf32>
      %168 = arith.mulf %162, %162 : vector<16x1xf32>
      %169 = arith.subf %167, %168 : vector<16x1xf32>
      %170 = vector.broadcast %162 : vector<16x1xf32> to vector<16x128xf32>
      %171 = arith.subf %arg22, %170 : vector<16x128xf32>
      %cst_85 = arith.constant 9.99999974E-6 : f32
      %172 = vector.broadcast %cst_85 : f32 to vector<16x1xf32>
      %173 = arith.addf %169, %172 : vector<16x1xf32>
      %174 = math.rsqrt %173 : vector<16x1xf32>
      %175 = vector.broadcast %174 : vector<16x1xf32> to vector<16x128xf32>
      %176 = arith.mulf %171, %175 : vector<16x128xf32>
      %177 = vector.broadcast %153 : vector<1x128xf32> to vector<16x128xf32>
      %178 = arith.mulf %176, %177 : vector<16x128xf32>
      %179 = vector.broadcast %156 : vector<1x128xf32> to vector<16x128xf32>
      %180 = arith.addf %178, %179 : vector<16x128xf32>
      %cst_86 = arith.constant 0.000000e+00 : f32
      %181 = vector.broadcast %cst_86 : f32 to vector<16x128xf32>
      %182 = arith.maximumf %180, %181 : vector<16x128xf32>
      %183 = arith.index_cast %arg21 : i32 to index
      %184 = memref.load %arg11[%183] : memref<3xf32, #tpu.memory_space<smem>>
      %cst_87 = arith.constant dense<0.000000e+00> : vector<48x128xf32>
      %185 = tpu.matmul %15, %182, %cst_87 {dimension_numbers = #tpu.dot_dimension_numbers<[1], [0], [0], [1], [0, 0, 1, 1], [], []>} : vector<48x16xf32>, vector<16x128xf32>, vector<48x128xf32> -> vector<48x128xf32>
      %186 = arith.addf %185, %43 : vector<48x128xf32>
      %cst_88 = arith.constant 0.000000e+00 : f32
      %187 = vector.broadcast %cst_88 : f32 to vector<48x128xf32>
      %188 = arith.maximumf %186, %187 : vector<48x128xf32>
      %cst_89 = arith.constant 1.000000e-07 : f32
      %189 = vector.broadcast %cst_89 : f32 to vector<48x128xf32>
      %190 = arith.addf %188, %189 : vector<48x128xf32>
      %191 = vector.broadcast %184 : f32 to vector<48x128xf32>
      %192 = arith.mulf %190, %191 : vector<48x128xf32>
      %c0_90 = arith.constant 0 : index
      %c0_91 = arith.constant 0 : index
      %193 = vector.load %arg19[%c0_90, %c0_91] : memref<48x128xf32, #tpu.memory_space<vmem>>, vector<48x128xf32>
      tpu.vector_store %arg19[%c0_90, %c0_91], %192 {strides = array<i32>} : memref<48x128xf32, #tpu.memory_space<vmem>>, vector<48x128xf32>,
      %cst_92 = arith.constant -1.000000e+30 : f32
      %194 = vector.broadcast %cst_92 : f32 to vector<16x128xf32>
      %c0_i32_93 = arith.constant 0 : i32
      %c6_i32_94 = arith.constant 6 : i32
      %195 = arith.addi %c0_i32_93, %c6_i32_94 : i32
      %c1_i32_95 = arith.constant 1 : i32
      %196 = scf.for %arg23 = %c0_i32_93 to %195 step %c1_i32_95 iter_args(%arg24 = %194) -> (vector<16x128xf32>)  : i32 {
        %c8_i32 = arith.constant 8 : i32
        %265 = arith.muli %arg23, %c8_i32 : i32
        %266 = tpu.assume_multiple %265, 8 : i32
        %267 = arith.index_cast %266 : i32 to index
        %c0_119 = arith.constant 0 : index
        %268 = vector.load %arg19[%267, %c0_119] : memref<48x128xf32, #tpu.memory_space<vmem>>, vector<8x128xf32>
        %269 = arith.index_cast %266 : i32 to index
        %c0_120 = arith.constant 0 : index
        %270 = vector.load %arg20[%269, %c0_120] : memref<48x16xf32, #tpu.memory_space<vmem>>, vector<8x16xf32>
        %271 = vector.shape_cast %268 : vector<8x128xf32> to vector<8x1x128xf32>
        %272 = vector.shape_cast %270 : vector<8x16xf32> to vector<8x16x1xf32>
        %273 = vector.broadcast %271 : vector<8x1x128xf32> to vector<8x16x128xf32>
        %274 = vector.broadcast %272 : vector<8x16x1xf32> to vector<8x16x128xf32>
        %275 = arith.addf %273, %274 : vector<8x16x128xf32>
        %cst_121 = arith.constant dense<0xFF800000> : vector<16x128xf32>
        %276 = vector.multi_reduction <maximumf>, %275, %cst_121 [0] : vector<8x16x128xf32> to vector<16x128xf32>
        %277 = arith.maximumf %arg24, %276 : vector<16x128xf32>
        scf.yield %277 : vector<16x128xf32>
      }
      %c6_i32_96 = arith.constant 6 : i32
      %cst_97 = arith.constant dense<0.000000e+00> : vector<48x128xf32>
      %197 = tpu.matmul %20, %196, %cst_97 {dimension_numbers = #tpu.dot_dimension_numbers<[1], [0], [0], [1], [0, 0, 1, 1], [], []>} : vector<48x16xf32>, vector<16x128xf32>, vector<48x128xf32> -> vector<48x128xf32>
      %198 = arith.subf %192, %197 : vector<48x128xf32>
      %199 = math.exp %198 : vector<48x128xf32>
      %200 = arith.mulf %190, %199 : vector<48x128xf32>
      %201 = tpu.concatenate %199, %200 in 1 : vector<48x128xf32>, vector<48x128xf32> -> vector<48x256xf32>
      %cst_98 = arith.constant dense<0.000000e+00> : vector<16x256xf32>
      %202 = tpu.matmul %26, %201, %cst_98 {dimension_numbers = #tpu.dot_dimension_numbers<[1], [0], [0], [1], [0, 0, 1, 1], [], []>} : vector<16x48xf32>, vector<48x256xf32>, vector<16x256xf32> -> vector<16x256xf32>
      %203 = vector.extract_strided_slice %202 {offsets = [0, 0], sizes = [16, 128], strides = [1, 1]} : vector<16x256xf32> to vector<16x128xf32>
      %204 = vector.extract_strided_slice %202 {offsets = [0, 128], sizes = [16, 128], strides = [1, 1]} : vector<16x256xf32> to vector<16x128xf32>
      %cst_99 = arith.constant 1.000000e-30 : f32
      %205 = vector.broadcast %cst_99 : f32 to vector<16x128xf32>
      %206 = arith.maximumf %203, %205 : vector<16x128xf32>
      %207 = tpu.reciprocal %206 {approx = true} : vector<16x128xf32> -> vector<16x128xf32>
      %208 = arith.mulf %206, %207 : vector<16x128xf32>
      %cst_100 = arith.constant 2.000000e+00 : f32
      %209 = vector.broadcast %cst_100 : f32 to vector<16x128xf32>
      %210 = arith.subf %209, %208 : vector<16x128xf32>
      %211 = arith.mulf %207, %210 : vector<16x128xf32>
      %212 = arith.mulf %204, %211 : vector<16x128xf32>
      %213 = arith.addf %212, %182 : vector<16x128xf32>
      %214 = arith.index_cast %arg21 : i32 to index
      %c0_101 = arith.constant 0 : index
      %c0_102 = arith.constant 0 : index
      %215 = vector.load %arg12[%214, %c0_101, %c0_102] : memref<3x128x128xf32, #tpu.memory_space<vmem>>, vector<1x128x128xf32>
      %216 = vector.shape_cast %215 : vector<1x128x128xf32> to vector<128x128xf32>
      %cst_103 = arith.constant dense<0.000000e+00> : vector<16x128xf32>
      %217 = tpu.matmul %213, %216, %cst_103 {dimension_numbers = #tpu.dot_dimension_numbers<[1], [0], [0], [1], [0, 0, 1, 1], [], []>} : vector<16x128xf32>, vector<128x128xf32>, vector<16x128xf32> -> vector<16x128xf32>
      %218 = arith.index_cast %arg21 : i32 to index
      %c0_104 = arith.constant 0 : index
      %c0_105 = arith.constant 0 : index
      %219 = vector.load %arg13[%218, %c0_104, %c0_105] : memref<3x1x128xf32, #tpu.memory_space<vmem>>, vector<1x1x128xf32>
      %220 = vector.shape_cast %219 : vector<1x1x128xf32> to vector<1x128xf32>
      %221 = vector.broadcast %220 : vector<1x128xf32> to vector<16x128xf32>
      %222 = arith.addf %217, %221 : vector<16x128xf32>
      %223 = arith.index_cast %arg21 : i32 to index
      %c0_106 = arith.constant 0 : index
      %c0_107 = arith.constant 0 : index
      %224 = vector.load %arg14[%223, %c0_106, %c0_107] : memref<3x1x128xf32, #tpu.memory_space<vmem>>, vector<1x1x128xf32>
      %225 = vector.shape_cast %224 : vector<1x1x128xf32> to vector<1x128xf32>
      %226 = arith.index_cast %arg21 : i32 to index
      %c0_108 = arith.constant 0 : index
      %c0_109 = arith.constant 0 : index
      %227 = vector.load %arg15[%226, %c0_108, %c0_109] : memref<3x1x128xf32, #tpu.memory_space<vmem>>, vector<1x1x128xf32>
      %228 = vector.shape_cast %227 : vector<1x1x128xf32> to vector<1x128xf32>
      %229 = vector.broadcast %9 : vector<1x128xf32> to vector<16x128xf32>
      %230 = arith.mulf %222, %229 : vector<16x128xf32>
      %cst_110 = arith.constant dense<0.000000e+00> : vector<16xf32>
      %231 = vector.multi_reduction <add>, %230, %cst_110 [1] : vector<16x128xf32> to vector<16xf32>
      %232 = vector.shape_cast %231 : vector<16xf32> to vector<16x1xf32>
      %233 = vector.broadcast %cst_61 : f32 to vector<16x1xf32>
      %234 = arith.mulf %232, %233 : vector<16x1xf32>
      %235 = arith.mulf %230, %222 : vector<16x128xf32>
      %cst_111 = arith.constant dense<0.000000e+00> : vector<16xf32>
      %236 = vector.multi_reduction <add>, %235, %cst_111 [1] : vector<16x128xf32> to vector<16xf32>
      %237 = vector.shape_cast %236 : vector<16xf32> to vector<16x1xf32>
      %238 = vector.broadcast %cst_61 : f32 to vector<16x1xf32>
      %239 = arith.mulf %237, %238 : vector<16x1xf32>
      %240 = arith.mulf %234, %234 : vector<16x1xf32>
      %241 = arith.subf %239, %240 : vector<16x1xf32>
      %242 = vector.broadcast %234 : vector<16x1xf32> to vector<16x128xf32>
      %243 = arith.subf %222, %242 : vector<16x128xf32>
      %cst_112 = arith.constant 9.99999974E-6 : f32
      %244 = vector.broadcast %cst_112 : f32 to vector<16x1xf32>
      %245 = arith.addf %241, %244 : vector<16x1xf32>
      %246 = math.rsqrt %245 : vector<16x1xf32>
      %247 = vector.broadcast %246 : vector<16x1xf32> to vector<16x128xf32>
      %248 = arith.mulf %243, %247 : vector<16x128xf32>
      %249 = vector.broadcast %225 : vector<1x128xf32> to vector<16x128xf32>
      %250 = arith.mulf %248, %249 : vector<16x128xf32>
      %251 = vector.broadcast %228 : vector<1x128xf32> to vector<16x128xf32>
      %252 = arith.addf %250, %251 : vector<16x128xf32>
      %cst_113 = arith.constant 0.000000e+00 : f32
      %253 = vector.broadcast %cst_113 : f32 to vector<16x128xf32>
      %254 = arith.maximumf %252, %253 : vector<16x128xf32>
      %255 = arith.index_cast %arg21 : i32 to index
      %c0_114 = arith.constant 0 : index
      %c0_115 = arith.constant 0 : index
      %256 = vector.load %arg16[%255, %c0_114, %c0_115] : memref<3x128x128xf32, #tpu.memory_space<vmem>>, vector<1x128x128xf32>
      %257 = vector.shape_cast %256 : vector<1x128x128xf32> to vector<128x128xf32>
      %cst_116 = arith.constant dense<0.000000e+00> : vector<16x128xf32>
      %258 = tpu.matmul %254, %257, %cst_116 {dimension_numbers = #tpu.dot_dimension_numbers<[1], [0], [0], [1], [0, 0, 1, 1], [], []>} : vector<16x128xf32>, vector<128x128xf32>, vector<16x128xf32> -> vector<16x128xf32>
      %259 = arith.index_cast %arg21 : i32 to index
      %c0_117 = arith.constant 0 : index
      %c0_118 = arith.constant 0 : index
      %260 = vector.load %arg17[%259, %c0_117, %c0_118] : memref<3x1x128xf32, #tpu.memory_space<vmem>>, vector<1x1x128xf32>
      %261 = vector.shape_cast %260 : vector<1x1x128xf32> to vector<1x128xf32>
      %262 = vector.broadcast %261 : vector<1x128xf32> to vector<16x128xf32>
      %263 = arith.addf %258, %262 : vector<16x128xf32>
      %264 = arith.addf %arg22, %263 : vector<16x128xf32>
      scf.yield %264 : vector<16x128xf32>
    }
    %c2_i32_64 = arith.constant 2 : i32
    %c0_65 = arith.constant 0 : index
    %c0_66 = arith.constant 0 : index
    %c0_67 = arith.constant 0 : index
    %120 = vector.load %arg9[%c0_65, %c0_66, %c0_67] : memref<3x1x128xf32, #tpu.memory_space<vmem>>, vector<1x1x128xf32>
    %121 = vector.shape_cast %120 : vector<1x1x128xf32> to vector<1x128xf32>
    %c0_68 = arith.constant 0 : index
    %c0_69 = arith.constant 0 : index
    %c0_70 = arith.constant 0 : index
    %122 = vector.load %arg10[%c0_68, %c0_69, %c0_70] : memref<3x1x128xf32, #tpu.memory_space<vmem>>, vector<1x1x128xf32>
    %123 = vector.shape_cast %122 : vector<1x1x128xf32> to vector<1x128xf32>
    %124 = vector.broadcast %4 : vector<1x128xf32> to vector<16x128xf32>
    %125 = arith.mulf %119, %124 : vector<16x128xf32>
    %cst_71 = arith.constant dense<0.000000e+00> : vector<16xf32>
    %126 = vector.multi_reduction <add>, %125, %cst_71 [1] : vector<16x128xf32> to vector<16xf32>
    %127 = vector.shape_cast %126 : vector<16xf32> to vector<16x1xf32>
    %cst_72 = arith.constant 3.125000e-02 : f32
    %128 = vector.broadcast %cst_72 : f32 to vector<16x1xf32>
    %129 = arith.mulf %127, %128 : vector<16x1xf32>
    %130 = arith.mulf %125, %119 : vector<16x128xf32>
    %cst_73 = arith.constant dense<0.000000e+00> : vector<16xf32>
    %131 = vector.multi_reduction <add>, %130, %cst_73 [1] : vector<16x128xf32> to vector<16xf32>
    %132 = vector.shape_cast %131 : vector<16xf32> to vector<16x1xf32>
    %cst_74 = arith.constant 3.125000e-02 : f32
    %133 = vector.broadcast %cst_74 : f32 to vector<16x1xf32>
    %134 = arith.mulf %132, %133 : vector<16x1xf32>
    %135 = arith.mulf %129, %129 : vector<16x1xf32>
    %136 = arith.subf %134, %135 : vector<16x1xf32>
    %137 = vector.broadcast %129 : vector<16x1xf32> to vector<16x128xf32>
    %138 = arith.subf %119, %137 : vector<16x128xf32>
    %cst_75 = arith.constant 9.99999974E-6 : f32
    %139 = vector.broadcast %cst_75 : f32 to vector<16x1xf32>
    %140 = arith.addf %136, %139 : vector<16x1xf32>
    %141 = math.rsqrt %140 : vector<16x1xf32>
    %142 = vector.broadcast %141 : vector<16x1xf32> to vector<16x128xf32>
    %143 = arith.mulf %138, %142 : vector<16x128xf32>
    %144 = vector.broadcast %121 : vector<1x128xf32> to vector<16x128xf32>
    %145 = arith.mulf %143, %144 : vector<16x128xf32>
    %146 = vector.broadcast %123 : vector<1x128xf32> to vector<16x128xf32>
    %147 = arith.addf %145, %146 : vector<16x128xf32>
    %cst_76 = arith.constant 0.000000e+00 : f32
    %148 = vector.broadcast %cst_76 : f32 to vector<16x128xf32>
    %149 = arith.maximumf %147, %148 : vector<16x128xf32>
    %c0_77 = arith.constant 0 : index
    %c0_78 = arith.constant 0 : index
    %150 = vector.load %arg18[%c0_77, %c0_78] : memref<16x128xf32, #tpu.memory_space<vmem>>, vector<16x128xf32>
    tpu.vector_store %arg18[%c0_77, %c0_78], %149 {strides = array<i32>} : memref<16x128xf32, #tpu.memory_space<vmem>>, vector<16x128xf32>,
    return
  }
}

</mosaic_0001>

<bundles_post_ra>
// kernel: tpu_custom_call.1
= control target key start
LH: loop header
LB: loop body
LE: loop exit
PB: predicated region body
PF: predicated region fallthrough
CT: control target
= control target key end

     0   :  { %s3906_s0 = inlined_call_operand.vmem [shape: f32[16,8], index: 0, kind: input, shape index: {}]   ;;  %s3907_s1 = inlined_call_operand.vmem [shape: f32[48,4], index: 1, kind: input, shape index: {}]   ;;  %s3908_s2 = inlined_call_operand.vmem [shape: s32[48,1], index: 2, kind: input, shape index: {}]   ;;  %s3909_s3 = inlined_call_operand.vmem [shape: s32[48,1], index: 3, kind: input, shape index: {}]   ;;  %s3910_s4 = inlined_call_operand.vmem [shape: s32[1,48], index: 4, kind: input, shape index: {}]   ;;  %s3911_s5 = inlined_call_operand.vmem [shape: f32[8,128], index: 5, kind: input, shape index: {}]   ;;  %s3912_s6 = inlined_call_operand.vmem [shape: f32[1,128], index: 6, kind: input, shape index: {}]   ;;  %s3913_s7 = inlined_call_operand.vmem [shape: f32[4,128], index: 7, kind: input, shape index: {}]   ;;  %s3914_s8 = inlined_call_operand.vmem [shape: f32[1,128], index: 8, kind: input, shape index: {}]   ;;  %s3915_s9 = inlined_call_operand.vmem [shape: f32[3,1,128], index: 9, kind: input, shape index: {}]   ;;  %s3916_s10 = inlined_call_operand.vmem [shape: f32[3,1,128], index: 10, kind: input, shape index: {}]   ;;  %s3917_s11 = inlined_call_operand.vmem [shape: f32[3], index: 11, kind: input, shape index: {}]   ;;  %s3918_s12 = inlined_call_operand.hbm [shape: f32[3,128,128], index: 12, kind: input, shape index: {}]   ;;  %s3919_s13 = inlined_call_operand.vmem [shape: f32[3,1,128], index: 13, kind: input, shape index: {}]   ;;  %s3920_s14 = inlined_call_operand.vmem [shape: f32[3,1,128], index: 14, kind: input, shape index: {}]   ;;  %s3921_s15 = inlined_call_operand.vmem [shape: f32[3,1,128], index: 15, kind: input, shape index: {}]   ;;  %s3922_s16 = inlined_call_operand.hbm [shape: f32[3,128,128], index: 16, kind: input, shape index: {}]   ;;  %s3923_s17 = inlined_call_operand.vmem [shape: f32[3,1,128], index: 17, kind: input, shape index: {}]   ;;  %s3924_s18 = inlined_call_operand.hbm [shape: f32[16,128], index: 18, kind: output, shape index: {}]  }
   0x1   :  { %3963 = sst [smem:[#allocation34_spill]] %s3906_s0 }
   0x2   :  { %3964 = sst [smem:[#allocation35_spill]] %s3907_s1 }
   0x3   :  { %3965 = sst [smem:[#allocation36_spill]] %s3908_s2 }
   0x4   :  { %23 = vsyncpa [#allocation7], 0 }
   0x5   :  { %24 = vsyncpa [#allocation5], 0 }
   0x6   :  { %25 = vsyncpa [#allocation10], 0 }
   0x7   :  { %26 = vsyncpa [#allocation6], 0  ;;  %s55_s29 = sshll.u32 %s3917_s11, 4  ;;  %s56_s29 = int_to_ptr.vmem [resolvable:$true] %s55_s29 }
   0x8   :  { %s2977_s30 = scalar_lea.vmem %s56_s29, 16  ;;  %p2982_p1 = scmp.lt.s32.totalorder %s56_s29, %s56_s29 }
   0x9   :  { %p2978_p0 = scmp.ne.s32.totalorder %s56_s29, %s2977_s30  ;;  %p2983_p2 = scmp.lt.s32.totalorder %s2977_s30, %s2977_s30 }
   0xb   :  { %p2984_p3 = por %p2983_p2, %p2982_p1 }
   0xd   :  { %p2985_p4 = pnand %p2984_p3, %p2978_p0 }
   0xf   :  { %2988 = shalt.err (!%p2985_p4)
}
  0x10   :  { %s3135_s0 = smov [#allocation4]   ;;  %s3136_s19 = smov [#allocation8]  }
  0x11   :  { %58 = dma.vmem_to_smem %s56_s29, 16, %s3135_s0, [#allocation7]  }
  0x12   :  { %s64_s1 = sshll.u32 %s3136_s19, 4  ;;  %s2989_s22 = scalar_lea.hbm %s3918_s12, 6144  ;;  %s65_s1 = int_to_ptr.vmem [resolvable:$true] %s64_s1 }
  0x13   :  { %p2990_p5 = scmp.ne.s32.totalorder %s3918_s12, %s2989_s22  ;;  %p2993_p6 = scmp.lt.u32.totalorder %s2989_s22, %s3918_s12 }
  0x15   :  { %p2995_p7 = pnand %p2993_p6, %p2990_p5 }
  0x17   :  { %2998 = shalt.err (!%p2995_p7)
}
  0x18   :  { %s2999_s25 = scalar_lea.vmem %s65_s1, 6144  ;;  %p3004_p9 = scmp.lt.s32.totalorder %s65_s1, %s65_s1 }
  0x19   :  { %p3000_p8 = scmp.ne.s32.totalorder %s65_s1, %s2999_s25  ;;  %p3005_p10 = scmp.lt.s32.totalorder %s2999_s25, %s2999_s25 }
  0x1b   :  { %p3006_p11 = por %p3005_p10, %p3004_p9 }
  0x1d   :  { %p3007_p12 = pnand %p3006_p11, %p3000_p8 }
  0x1f   :  { %3010 = shalt.err (!%p3007_p12)
}
  0x20   :  { %s3137_s26 = smov 128   ;;  %s3138_s27 = smov 8  }
  0x21   :  { %70 = dma.hbm_to_vmem [thread:$0]  %s3918_s12, 6144, %s65_s1, [#allocation5], %s3137_s26, %s3137_s26, %s3138_s27  }
  0x22   :  { %s3139_s30 = smov [#allocation9]   ;;  %s3011_s21 = scalar_lea.hbm %s3922_s16, 6144 }
  0x23   :  { %s82_s0 = sshll.u32 %s3139_s30, 4  ;;  %p3012_p13 = scmp.ne.s32.totalorder %s3922_s16, %s3011_s21  ;;  %s83_s0 = int_to_ptr.vmem [resolvable:$true] %s82_s0 }
  0x24   :  { %p3015_p0 = scmp.lt.u32.totalorder %s3011_s21, %s3922_s16 }
  0x26   :  { %p3017_p1 = pnand %p3015_p0, %p3012_p13 }
  0x28   :  { %3020 = shalt.err (!%p3017_p1)
}
  0x29   :  { %s3021_s24 = scalar_lea.vmem %s83_s0, 6144  ;;  %p3026_p3 = scmp.lt.s32.totalorder %s83_s0, %s83_s0 }
  0x2a   :  { %p3022_p2 = scmp.ne.s32.totalorder %s83_s0, %s3021_s24  ;;  %p3027_p4 = scmp.lt.s32.totalorder %s3021_s24, %s3021_s24 }
  0x2c   :  { %p3028_p5 = por %p3027_p4, %p3026_p3 }
  0x2e   :  { %p3029_p6 = pnand %p3028_p5, %p3022_p2 }
  0x30   :  { %3032 = shalt.err (!%p3029_p6)
}
  0x31   :  { %88 = dma.hbm_to_vmem [thread:$0]  %s3922_s16, 6144, %s83_s0, [#allocation10], %s3137_s26, %s3137_s26, %s3138_s27  }
  0x32   :  { %3091 = dma.done.wait [#allocation7], 16  }
  0x33   :  { %3092 = vsyncadd [#allocation7], 4294967280 }
  0x34   :  { %3093 = dma.done.wait [#allocation5], 6144  }
  0x35   :  { %3094 = vsyncadd [#allocation5], 4294961152 }
  0x36   :  { %3095 = dma.done.wait [#allocation10], 6144  }
  0x37   :  { %3096 = vsyncadd [#allocation10], 4294961152 }
  0x38   :  { %100 = sfence }
  0x39   :  { %v228_v0 = vld [vmem:[%s3911_s5] sm:$0xff]  ;;  %s3966_s19 = sld [smem:[#allocation34_spill]]  ;;  %vm236_vm0 = vcmask 64512   ;;  %s3967_s22 = sld [smem:[#allocation36_spill]]  ;;  %v3140_v4 = vmov 0   ;;  %v101_v6 = vlaneseq  ;;  %v3933_v13 = vmov 0.0  }
  0x3a   :  { %2467 = vmatprep.subr.mxu0 %v228_v0  ;;  %2925 = vset.pattern.permute.xlu0 %v3140_v4  ;;  %v2290_v10 = vld [vmem:[%s3910_s4] ss:$0 sm:$0xff]  ;;  %v152_v21 = vld [vmem:[%s3909_s3 + $0x8] sm:$0xff]  ;;  %v153_v22 = vld [vmem:[%s3909_s3 + $0x10] sm:$0xff]  ;;  %vm351_vm5 = vcmask 1043456   ;;  %s3970_s29 = sld [smem:[#allocation35_spill]] }
  0x3b   :  { %2468 = vmatpush3.msra.mxu0 %v228_v0  ;;  %2926 = vset.pattern.permute.xlu1 %v3140_v4  ;;  %v3291_v8 = vand.u32 127, %v101_v6  ;;  %v3293_v9 = vshrl.u32 %v101_v6, 7  ;;  %v151_v20 = vld [vmem:[%s3909_s3] sm:$0xff]  ;;  %v154_v23 = vld [vmem:[%s3909_s3 + $0x18] sm:$0xff]  ;;  %v156_v25 = vld [vmem:[%s3909_s3 + $0x28] sm:$0xff]  ;;  %vm332_vm6 = vcmask 31744  }
  0x3c   :  { %v155_v24 = vld [vmem:[%s3909_s3 + $0x20] sm:$0xff]  ;;  %vm219_vm7 = vcmask 130048   ;;  %s450_s24 = sld [smem:[#allocation4]] }
  0x3d   :  { %3968 = vst [vmem:[#allocation16_spill] sm:$0xff] %v3293_v9  ;;  %vm103_vm1 = vcmp.lt.s32.totalorder %v3291_v8, 32  ;;  %vm106_vm2 = vcmp.lt.s32.totalorder %v3291_v8, 64  ;;  %v195_v12 = vadd.s32 8, %v3293_v9  ;;  %vm201_vm3 = vcmp.eq.s32.totalorder %v3293_v9, %v2290_v10  ;;  %v324_v26 = vld [vmem:[%s3913_s7] sm:$0xf] }
  0x3e   :  { %v3306_v14 = vsel %vm103_vm1, 1.0, %v3933_v13  ;;  %v3309_v15 = vsel %vm106_vm2, 1.0, %v3933_v13  ;;  %v3312_v16 = vsel %vm201_vm3, 1.0, %v3933_v13  ;;  %2472 = vmatprep.subr.msk.mxu1 %vm351_vm5, %v324_v26  ;;  %v2299_v0 = vld [vmem:[%s3912_s6] ss:$0 sm:$0xff] }
  0x3f   :  { %v226_v1 = vld [vmem:[%s3966_s19] sm:$0xff]  ;;  %v227_v2 = vld [vmem:[%s3966_s19 + $0x8] sm:$0xff]  ;;  %v111_v5 = vld [vmem:[%s3967_s22 + $0x10] sm:$0xff]  ;;  %3969 = vst [vmem:[#allocation17_spill] sm:$0xff] %v3306_v14  ;;  %vm202_vm4 = vcmp.eq.s32.totalorder %v195_v12, %v2290_v10  ;;  %2473 = vmatpush3.msk.msra.mxu1 %vm351_vm5, %v324_v26 }
  0x40   :  { %2469 = vmatprep.mubr.msk.f32.mxu0 %vm236_vm0, %v226_v1  ;;  %v109_v3 = vld [vmem:[%s3967_s22] sm:$0xff]  ;;  %v110_v7 = vld [vmem:[%s3967_s22 + $0x8] sm:$0xff]  ;;  %122 = vperm.xlu1 %2926, %v111_v5   ;;  %v112_v11 = vld [vmem:[%s3967_s22 + $0x18] sm:$0xff]  ;;  %v3318_v18 = vsel %vm202_vm4, 1.0, %v3933_v13 }
  0x41   :  { %2470 = vmatmul.mubr.msk.f32.vlgmr.msra.gmra.mrb[0].mxu0 %vm236_vm0, %v227_v2  ;;  %116 = vperm.xlu0 %2925, %v109_v3   ;;  %v113_v17 = vld [vmem:[%s3967_s22 + $0x20] sm:$0xff]  ;;  %v114_v19 = vld [vmem:[%s3967_s22 + $0x28] sm:$0xff]  ;;  %v320_v29 = vld [vmem:[%s3970_s29 + $0x10] sm:$0xff] }
  0x42   :  { %v318_v27 = vld [vmem:[%s3970_s29] sm:$0xff]  ;;  %v319_v28 = vld [vmem:[%s3970_s29 + $0x8] sm:$0xff]  ;;  %v321_v30 = vld [vmem:[%s3970_s29 + $0x18] sm:$0xff] }
  0x43   :  { %2474 = vmatprep.mubr.msk.f32.mxu1 %vm332_vm6, %v318_v27  ;;  %v322_v31 = vld [vmem:[%s3970_s29 + $0x20] sm:$0xff]  ;;  %v323_v32 = vld [vmem:[%s3970_s29 + $0x28] sm:$0xff] }
  0x44   :  { %125 = vperm.xlu1 %2926, %v112_v11   ;;  %2475 = vmatmul.mubr.msk.f32.vlgmr.msra.gmra.mrb[0].mxu1 %vm332_vm6, %v319_v28 }
  0x45   :  { %119 = vperm.xlu0 %2925, %v110_v7   ;;  %2477 = vmatprep.mubr.msk.f32.mxu1 %vm332_vm6, %v320_v29 }
  0x48   :  { %131 = vperm.xlu1 %2926, %v114_v19   ;;  %2478 = vmatmul.mubr.msk.f32.gmra.mrb[2].mxu1 %vm332_vm6, %v321_v30 }
  0x49   :  { %128 = vperm.xlu0 %2925, %v113_v17   ;;  %2480 = vmatprep.mubr.msk.f32.mxu1 %vm332_vm6, %v322_v31 }
  0x4c   :  { %161 = vperm.xlu1 %2926, %v152_v21   ;;  %2481 = vmatmul.mubr.msk.f32.gmra.mrb[4].mxu1 %vm332_vm6, %v323_v32 }
  0x4d   :  { %158 = vperm.xlu0 %2925, %v151_v20  }
  0x50   :  { %167 = vperm.xlu1 %2926, %v154_v23  }
  0x51   :  { %164 = vperm.xlu0 %2925, %v153_v22  }
  0x54   :  { %173 = vperm.xlu1 %2926, %v156_v25  }
  0x55   :  { %170 = vperm.xlu0 %2925, %v155_v24  }
  0xbf   :  { %v123_v35 = vpop.permute.xlu1 %122 }
  0xc0   :  { %v117_v33 = vpop.permute.xlu0 %116  ;;  %vm135_vm15 = vcmp.eq.s32.totalorder %v3291_v8, %v123_v35 }
  0xc1   :  { %vm133_vm8 = vcmp.eq.s32.totalorder %v3291_v8, %v117_v33  ;;  %v3416_v6 = vsel %vm135_vm15, 1.0, %v3933_v13  ;;  %v576_v33 = vstv %s450_s24 }
  0xc2   :  { %v3364_v34 = vsel %vm133_vm8, 1.0, %v3933_v13  ;;  %3972 = vst [vmem:[#allocation19_spill] sm:$0xff] %v3416_v6 }
  0xc3   :  { %3971 = vst [vmem:[#allocation18_spill] sm:$0xff] %v3364_v34  ;;  %2487 = vmatprep.mubr.msk.f32.mxu0 %vm219_vm7, %v3364_v34  ;;  %v126_v37 = vpop.permute.xlu1 %125 }
  0xc4   :  { %v120_v36 = vpop.permute.xlu0 %119  ;;  %vm136_vm1 = vcmp.eq.s32.totalorder %v3291_v8, %v126_v37 }
  0xc5   :  { %vm134_vm0 = vcmp.eq.s32.totalorder %v3291_v8, %v120_v36  ;;  %v3428_v10 = vsel %vm136_vm1, 1.0, %v3933_v13 }
  0xc6   :  { %v3419_v7 = vsel %vm134_vm0, 1.0, %v3933_v13  ;;  %3974 = vst [vmem:[#allocation21_spill] sm:$0xff] %v3428_v10 }
  0xc7   :  { %v132_v39 = vpop.permute.xlu1 %131  ;;  %3973 = vst [vmem:[#allocation20_spill] sm:$0xff] %v3419_v7 }
  0xc8   :  { %v129_v38 = vpop.permute.xlu0 %128  ;;  %vm138_vm3 = vcmp.eq.s32.totalorder %v3291_v8, %v132_v39 }
  0xc9   :  { %vm137_vm2 = vcmp.eq.s32.totalorder %v3291_v8, %v129_v38  ;;  %v3439_v12 = vsel %vm138_vm3, 1.0, %v3933_v13 }
  0xca   :  { %v3431_v11 = vsel %vm137_vm2, 1.0, %v3933_v13  ;;  %3976 = vst [vmem:[#allocation23_spill] sm:$0xff] %v3439_v12 }
  0xcb   :  { %v162_v42 = vpop.permute.xlu1 %161  ;;  %3975 = vst [vmem:[#allocation22_spill] sm:$0xff] %v3431_v11 }
  0xcc   :  { %v159_v40 = vpop.permute.xlu0 %158  ;;  %vm176_vm10 = vcmp.eq.s32.totalorder %v3291_v8, %v162_v42 }
  0xcd   :  { %vm175_vm9 = vcmp.eq.s32.totalorder %v3291_v8, %v159_v40  ;;  %v3375_v44 = vsel %vm176_vm10, 1.0, %v3933_v13 }
  0xce   :  { %v3370_v41 = vsel %vm175_vm9, 1.0, %v3933_v13  ;;  %v2294_v47 = vadd.f32 -1.0, %v3375_v44 }
  0xcf   :  { %v2293_v43 = vadd.f32 -1.0, %v3370_v41  ;;  %v168_v49 = vpop.permute.xlu1 %167 }
  0xd0   :  { %v165_v45 = vpop.permute.xlu0 %164  ;;  %v214_v50 = vmul.f32 1e+30, %v2294_v47  ;;  %vm178_vm12 = vcmp.eq.s32.totalorder %v3291_v8, %v168_v49 }
  0xd1   :  { %v213_v46 = vmul.f32 1e+30, %v2293_v43  ;;  %vm177_vm11 = vcmp.eq.s32.totalorder %v3291_v8, %v165_v45  ;;  %v3386_v52 = vsel %vm178_vm12, 1.0, %v3933_v13 }
  0xd2   :  { %v3380_v48 = vsel %vm177_vm11, 1.0, %v3933_v13  ;;  %221 = vst.msk [vmem:[#allocation3 + $0x8] sm:$0xff] %vm219_vm7, %v214_v50  ;;  %v2296_v55 = vadd.f32 -1.0, %v3386_v52 }
  0xd3   :  { %220 = vst.msk [vmem:[#allocation3] sm:$0xff] %vm219_vm7, %v213_v46  ;;  %v2295_v51 = vadd.f32 -1.0, %v3380_v48  ;;  %v174_v57 = vpop.permute.xlu1 %173 }
  0xd4   :  { %v171_v53 = vpop.permute.xlu0 %170  ;;  %v216_v58 = vmul.f32 1e+30, %v2296_v55  ;;  %vm180_vm14 = vcmp.eq.s32.totalorder %v3291_v8, %v174_v57 }
  0xd5   :  { %v215_v54 = vmul.f32 1e+30, %v2295_v51  ;;  %vm179_vm13 = vcmp.eq.s32.totalorder %v3291_v8, %v171_v53  ;;  %v3398_v60 = vsel %vm180_vm14, 1.0, %v3933_v13  ;;  %v2302_v8 = vld [vmem:[%s3914_s8] ss:$0 sm:$0xff]  ;;  %s3504_s8 = smov 0  }
  0xd6   :  { %v3392_v56 = vsel %vm179_vm13, 1.0, %v3933_v13  ;;  %223 = vst.msk [vmem:[#allocation3 + $0x18] sm:$0xff] %vm219_vm7, %v216_v58  ;;  %v2298_v62 = vadd.f32 -1.0, %v3398_v60 }
  0xd7   :  { %222 = vst.msk [vmem:[#allocation3 + $0x10] sm:$0xff] %vm219_vm7, %v215_v54  ;;  %v2297_v59 = vadd.f32 -1.0, %v3392_v56 }
  0xd8   :  { %v218_v63 = vmul.f32 1e+30, %v2298_v62 }
  0xd9   :  { %v217_v61 = vmul.f32 1e+30, %v2297_v59 }
  0xda   :  { %225 = vst.msk [vmem:[#allocation3 + $0x28] sm:$0xff] %vm219_vm7, %v218_v63 }
  0xdb   :  { %224 = vst.msk [vmem:[#allocation3 + $0x20] sm:$0xff] %vm219_vm7, %v217_v61 }
 0x114   :  { %v2471_v1 = vpop.f32.mrb[0].mxu0 }
 0x115   :  { %v3407_v2 = vadd.f32 %v2471_v1, %v2299_v0  ;;  %v309_v3 = vpop.f32.mrb[1].mxu0 }
 0x116   :  { %v3409_v4 = vadd.f32 %v2299_v0, %v309_v3 }
 0x117   :  { %v2476_v17 = vpop.f32.mrb[0].mxu1 }
 0x118   :  { %v2675_v5 = vpack.c.bf16 %v3407_v2, %v3409_v4  ;;  %v421_v19 = vpop.f32.mrb[1].mxu1  ;;  %v3446_v24 = vadd.f32 %v2476_v17, %v2302_v8  ;;  %v3500_v17 = vmov -1e+30  }
 0x119   :  { %v3448_v25 = vadd.f32 %v2302_v8, %v421_v19  ;;  %v3502_v19 = vmov -1e+30  }
 0x11a   :  { %2676 = vmatprep.subr.bf16.mxu0 %v2675_v5  ;;  %3977 = vst [vmem:[#allocation24_spill] sm:$0xff] %v3446_v24 }
 0x11b   :  { %2678 = vmatpush3.bf16.msra.mxu0 %v2675_v5  ;;  %v2479_v20 = vpop.f32.mrb[2].mxu1  ;;  %3978 = vst [vmem:[#allocation25_spill] sm:$0xff] %v3448_v25 }
 0x11c   :  { %v431_v21 = vpop.f32.mrb[3].mxu1  ;;  %v3451_v29 = vadd.f32 %v2479_v20, %v2302_v8 }
 0x11d   :  { %v3454_v31 = vadd.f32 %v2302_v8, %v431_v21 }
 0x11e   :  { %2488 = vmatmul.mubr.msk.f32.vlgmr.msra.gmra.mrb[2].mxu0 %vm219_vm7, %v3419_v7  ;;  %3979 = vst [vmem:[#allocation26_spill] sm:$0xff] %v3451_v29 }
 0x11f   :  { %2490 = vmatprep.mubr.msk.f32.mxu0 %vm219_vm7, %v3416_v6  ;;  %v2482_v22 = vpop.f32.mrb[4].mxu1  ;;  %3980 = vst [vmem:[#allocation27_spill] sm:$0xff] %v3454_v31 }
 0x120   :  { %v441_v23 = vpop.f32.mrb[5].mxu1  ;;  %v3459_v40 = vadd.f32 %v2482_v22, %v2302_v8 }
 0x121   :  { %v3464_v45 = vadd.f32 %v2302_v8, %v441_v23 }
 0x122   :  { %2491 = vmatmul.mubr.msk.f32.gmra.mrb[4].mxu0 %vm219_vm7, %v3428_v10  ;;  %3981 = vst [vmem:[#allocation28_spill] sm:$0xff] %v3459_v40 }
 0x123   :  { %2493 = vmatprep.mubr.msk.f32.mxu0 %vm219_vm7, %v3431_v11  ;;  %3982 = vst [vmem:[#allocation29_spill] sm:$0xff] %v3464_v45 }
 0x126   :  { %2494 = vmatmul.mubr.msk.f32.gmra.mrb[6].mxu0 %vm219_vm7, %v3439_v12 }
 0x1f1   :  { %v2489_v26 = vpop.f32.mrb[2].mxu0 }
 0x1f2   :  { %v541_v27 = vadd.f32 %v2489_v26, %v3446_v24  ;;  %v535_v28 = vpop.f32.mrb[3].mxu0 }
 0x1f3   :  { %v536_v30 = vadd.f32 %v535_v28, %v3448_v25 }
 0x1f4   :  { %v565_v32 = vmax.f32 %v541_v27, 0.0 }
 0x1f5   :  { %v564_v35 = vmax.f32 %v536_v30, 0.0  ;;  %v2492_v36 = vpop.f32.mrb[4].mxu0 }
 0x1f6   :  { %v3456_v37 = vadd.f32 1e-07, %v565_v32  ;;  %v551_v38 = vadd.f32 %v2492_v36, %v3451_v29  ;;  %v545_v39 = vpop.f32.mrb[5].mxu0 }
 0x1f7   :  { %v3461_v42 = vadd.f32 1e-07, %v564_v35  ;;  %v546_v43 = vadd.f32 %v545_v39, %v3454_v31 }
 0x1f8   :  { %v3467_v46 = vmul.f32 %v576_v33, %v3456_v37  ;;  %v567_v47 = vmax.f32 %v551_v38, 0.0 }
 0x1f9   :  { %v3470_v49 = vmul.f32 %v576_v33, %v3461_v42  ;;  %v566_v50 = vmax.f32 %v546_v43, 0.0  ;;  %v2495_v51 = vpop.f32.mrb[6].mxu0 }
 0x1fa   :  { %584 = vst [vmem:[#allocation2 + $0x8] sm:$0xff] %v3467_v46  ;;  %v3473_v53 = vadd.f32 1e-07, %v567_v47  ;;  %v561_v54 = vadd.f32 %v2495_v51, %v3459_v40  ;;  %v555_v55 = vpop.f32.mrb[7].mxu0 }
 0x1fb   :  { %583 = vst [vmem:[#allocation2] sm:$0xff] %v3470_v49  ;;  %v3477_v57 = vadd.f32 1e-07, %v566_v50  ;;  %v556_v58 = vadd.f32 %v555_v55, %v3464_v45 }
 0x1fc   :  { %v3481_v59 = vmul.f32 %v576_v33, %v3473_v53  ;;  %v569_v61 = vmax.f32 %v561_v54, 0.0 }
 0x1fd   :  { %v3484_v62 = vmul.f32 %v576_v33, %v3477_v57  ;;  %v568_v63 = vmax.f32 %v556_v58, 0.0 }
 0x1fe   :  { %586 = vst [vmem:[#allocation2 + $0x18] sm:$0xff] %v3481_v59  ;;  %v3487_v0 = vadd.f32 1e-07, %v569_v61 }
 0x1ff   :  { %585 = vst [vmem:[#allocation2 + $0x10] sm:$0xff] %v3484_v62  ;;  %v3490_v1 = vadd.f32 1e-07, %v568_v63 }
 0x200   :  { %v3493_v3 = vmul.f32 %v576_v33, %v3487_v0 }
 0x201   :  { %v3496_v5 = vmul.f32 %v576_v33, %v3490_v1 }
 0x202   :  { %588 = vst [vmem:[#allocation2 + $0x28] sm:$0xff] %v3493_v3 }
 0x203   :  { %587 = vst [vmem:[#allocation2 + $0x20] sm:$0xff] %v3496_v5 }
 0x204 LB: > { %v3983_v9 = vld [vmem:[#allocation16_spill] sm:$0xff]  ;;  %s2316_s12 = sshll.u32 %s3109_s8, 3  ;;  %v3142_v22 = vmov 1966171168   ;;  %s594_s8 = sadd.s32 1, %s3109_s8   ;;  %v3101_v17 = vphi %v3500_v17, %v3986_v17   ;;  %s3109_s8 = sphi %s3504_s8, %s594_s8   ;;  %v3105_v19 = vphi %v3502_v19, %v3987_v19  }
 0x205   : > { %v3932_v20 = vsub.s32 1, %v3983_v9  ;;  %v3517_v21 = vsub.s32 0, %v3983_v9  ;;  %v605_v23 = vunpack.c.l.s4 %v3142_v22  ;;  %s600_s1 = scalar_lea.vmem [#allocation3], %s2316_s12  ;;  %s598_s25 = scalar_lea.vmem [#allocation2], %s2316_s12  ;;  %v3931_v30 = vsub.s32 2, %v3983_v9 }
 0x206   : > { %v601_v8 = vld [vmem:[%s600_s1] sm:$0xff]  ;;  %v3930_v36 = vsub.s32 3, %v3983_v9  ;;  %v3929_v58 = vsub.s32 4, %v3983_v9  ;;  %p591_p7 = scmp.ge.s32.totalorder %s594_s8, 6  }
 0x207   : > { %3984 = vst [vmem:[#allocation30_spill] sm:$0xff] %v3517_v21  ;;  %v666_v26 = vrot.slane %v601_v8, %v3932_v20  ;;  %v655_v27 = vrot.slane %v601_v8, %v3517_v21  ;;  %v606_v32 = vunpack.c.0.s8 %v605_v23  ;;  %v677_v38 = vrot.slane %v601_v8, %v3931_v30  ;;  %2500 = vmatprep.mubr.msk.f32.mxu1 (%p591_p7), %vm219_vm7, %v3370_v41  ;;  %s3627_s21 = smov (%p591_p7), 1  }
 0x208   : > { %v688_v55 = vrot.slane %v601_v8, %v3930_v36  ;;  %vm949_vm4 = vcmask (%p591_p7), 392192  }
 0x209   : > { %668 = vbcast.lane.b32.xlu1 %v666_v26, 256  ;;  %657 = vbcast.lane.b32.xlu0 %v655_v27, 256  ;;  %v3525_v35 = vsub.s32 %v606_v32, %v3983_v9 }
 0x20a   : > { %v599_v28 = vld [vmem:[%s598_s25] sm:$0xff] }
 0x20b   : > { %v603_v33 = vcombine.high %v599_v28, %v599_v28  ;;  %3985 = vst [vmem:[#allocation31_spill] sm:$0xff] %v3525_v35  ;;  %v610_v39 = vrot.slane %v599_v28, %v3525_v35 }
 0x20d   : > { %672 = vbcast.lane.b32.xlu1 %v666_v26, 264  ;;  %661 = vbcast.lane.b32.xlu0 %v655_v27, 264  ;;  %v617_v43 = vrot.slane %v603_v33, %v3525_v35  ;;  %v618_v47 = vcombine.high %v610_v39, %v610_v39  ;;  %v626_v50 = vrot.slane %v610_v39, %v3525_v35 }
 0x20f   : > { %v633_v51 = vrot.slane %v617_v43, %v3525_v35  ;;  %v619_v54 = vcombine.high %v617_v43, %v617_v43  ;;  %v640_v61 = vrot.slane %v618_v47, %v3525_v35  ;;  %v743_v63 = vrot.slane %v626_v50, %v3517_v21 }
 0x210   : > { %v648_v22 = vcombine.high %v626_v50, %v626_v50  ;;  %v699_v47 = vrot.slane %v601_v8, %v3929_v58  ;;  %v3928_v50 = vsub.s32 5, %v3983_v9 }
 0x211   : > { %683 = vbcast.lane.b32.xlu1 %v677_v38, 264  ;;  %679 = vbcast.lane.b32.xlu0 %v677_v38, 256  ;;  %v759_v23 = vrot.slane %v633_v51, %v3517_v21  ;;  %v647_v26 = vrot.slane %v619_v54, %v3525_v35  ;;  %v649_v27 = vcombine.high %v633_v51, %v633_v51 }
 0x212   : > { %v747_v28 = vrot.slane %v640_v61, %v3517_v21  ;;  %v751_v32 = vrot.slane %v648_v22, %v3517_v21  ;;  %v650_v33 = vcombine.high %v640_v61, %v640_v61  ;;  %v710_v61 = vrot.slane %v601_v8, %v3928_v50 }
 0x213   : > { %v763_v39 = vrot.slane %v647_v26, %v3517_v21  ;;  %v767_v38 = vrot.slane %v649_v27, %v3517_v21  ;;  %v651_v43 = vcombine.high %v647_v26, %v647_v26  ;;  %v3935_v22 = vsub.s32 6, %v3983_v9 }
 0x214   : > { %v755_v54 = vrot.slane %v650_v33, %v3517_v21  ;;  %v3945_v26 = vsub.s32 7, %v3983_v9 }
 0x215   : > { %694 = vbcast.lane.b32.xlu1 %v688_v55, 264  ;;  %690 = vbcast.lane.b32.xlu0 %v688_v55, 256  ;;  %v771_v51 = vrot.slane %v651_v43, %v3517_v21  ;;  %v721_v55 = vrot.slane %v601_v8, %v3935_v22 }
 0x216   : > { %v732_v27 = vrot.slane %v601_v8, %v3945_v26 }
 0x219   : > { %705 = vbcast.lane.b32.xlu1 %v699_v47, 264  ;;  %701 = vbcast.lane.b32.xlu0 %v699_v47, 256 }
 0x21d   : > { %716 = vbcast.lane.b32.xlu1 %v710_v61, 264  ;;  %712 = vbcast.lane.b32.xlu0 %v710_v61, 256 }
 0x221   : > { %727 = vbcast.lane.b32.xlu1 %v721_v55, 264  ;;  %723 = vbcast.lane.b32.xlu0 %v721_v55, 256 }
 0x225   : > { %738 = vbcast.lane.b32.xlu1 %v732_v27, 264  ;;  %734 = vbcast.lane.b32.xlu0 %v732_v27, 256 }
 0x27b   : > { %v669_v33 = vpop.permute.xlu1 %668  ;;  %v658_v43 = vpop.permute.xlu0 %657 }
 0x27c   : > { %v780_v30 = vadd.f32 %v743_v63, %v658_v43  ;;  %v782_v55 = vadd.f32 %v747_v28, %v669_v33 }
 0x27f   : > { %v673_v47 = vpop.permute.xlu1 %672  ;;  %v662_v50 = vpop.permute.xlu0 %661 }
 0x280   : > { %v781_v61 = vadd.f32 %v743_v63, %v662_v50  ;;  %v783_v40 = vadd.f32 %v747_v28, %v673_v47 }
 0x283   : > { %v684_v58 = vpop.permute.xlu1 %683  ;;  %v680_v36 = vpop.permute.xlu0 %679 }
 0x284   : > { %v785_v20 = vadd.f32 %v751_v32, %v684_v58  ;;  %v784_v13 = vadd.f32 %v751_v32, %v680_v36 }
 0x286   : > { %v803_v22 = vmax.f32 %v781_v61, %v785_v20  ;;  %v796_v35 = vmax.f32 %v780_v30, %v784_v13 }
 0x287   : > { %v695_v21 = vpop.permute.xlu1 %694  ;;  %v691_v45 = vpop.permute.xlu0 %690 }
 0x288   : > { %v787_v9 = vadd.f32 %v755_v54, %v695_v21  ;;  %v786_v8 = vadd.f32 %v755_v54, %v691_v45 }
 0x28a   : > { %v804_v26 = vmax.f32 %v783_v40, %v787_v9  ;;  %v797_v27 = vmax.f32 %v782_v55, %v786_v8 }
 0x28b   : > { %v706_v31 = vpop.permute.xlu1 %705  ;;  %v702_v29 = vpop.permute.xlu0 %701 }
 0x28c   : > { %v789_v25 = vadd.f32 %v759_v23, %v706_v31  ;;  %v788_v24 = vadd.f32 %v759_v23, %v702_v29 }
 0x28e   : > { %v805_v12 = vmax.f32 %v803_v22, %v789_v25  ;;  %v798_v11 = vmax.f32 %v796_v35, %v788_v24 }
 0x28f   : > { %v717_v43 = vpop.permute.xlu1 %716  ;;  %v713_v63 = vpop.permute.xlu0 %712 }
 0x290   : > { %v791_v58 = vadd.f32 %v763_v39, %v717_v43  ;;  %v790_v36 = vadd.f32 %v763_v39, %v713_v63 }
 0x292   : > { %v806_v20 = vmax.f32 %v804_v26, %v791_v58  ;;  %v799_v13 = vmax.f32 %v797_v27, %v790_v36 }
 0x293   : > { %v728_v30 = vpop.permute.xlu1 %727  ;;  %v724_v32 = vpop.permute.xlu0 %723 }
 0x294   : > { %v793_v50 = vadd.f32 %v767_v38, %v728_v30  ;;  %v792_v28 = vadd.f32 %v767_v38, %v724_v32 }
 0x296   : > { %v807_v21 = vmax.f32 %v805_v12, %v793_v50  ;;  %v800_v45 = vmax.f32 %v798_v11, %v792_v28  ;;  %v3988_v12 = vmov (%p591_p7), 0.0  }
 0x297   : > { %v739_v9 = vpop.permute.xlu1 %738  ;;  %v735_v40 = vpop.permute.xlu0 %734  ;;  %1020 = vmatprep.mubr.f32.mxu0 (%p591_p7), %v3988_v12 }
 0x298   : > { %v795_v54 = vadd.f32 %v771_v51, %v739_v9  ;;  %v794_v33 = vadd.f32 %v771_v51, %v735_v40 }
 0x29a   : > { %v808_v31 = vmax.f32 %v806_v20, %v795_v54  ;;  %v801_v29 = vmax.f32 %v799_v13, %v794_v33  ;;  %593 = sbr.rel (!%p591_p7) target bundleno = 516 (0x204), region = 137 }
 0x29c   : > { %v809_v25 = vmax.f32 %v807_v21, %v808_v31  ;;  %v802_v24 = vmax.f32 %v800_v45, %v801_v29 }
 0x29e   : > { %v811_v35 = vmax.f32 %v3101_v17, %v809_v25   ;;  %v810_v23 = vmax.f32 %v3105_v19, %v802_v24   ;;  %v1052_v24 = vld [vmem:[#allocation8 + $0x28] sm:$0xff] (%p591_p7) }
 0x2a0   : > { %v3986_v17 = vmov %v811_v35  ;;  %v3987_v19 = vmov %v810_v23  ;;  %v2679_v11 = vpack.c.bf16 (%p591_p7), %v811_v35, %v810_v23  ;;  %v1053_v23 = vld [vmem:[#allocation8 + $0x30] sm:$0xff] (%p591_p7) }
 0x2a1   :  { %v1047_v17 = vld [vmem:[#allocation8] sm:$0xff]  ;;  %v1048_v19 = vld [vmem:[#allocation8 + $0x8] sm:$0xff] }
 0x2a2   :  { %2680 = vmatprep.subr.bf16.mxu1 %v2679_v11  ;;  %v2695_v39 = vpack.c.bf16 %v1048_v19, %v1047_v17  ;;  %v1055_v19 = vld [vmem:[#allocation8 + $0x40] sm:$0xff] }
 0x2a3   :  { %2682 = vmatpush3.bf16.msra.mxu1 %v2679_v11  ;;  %v1054_v11 = vld [vmem:[#allocation8 + $0x38] sm:$0xff] }
 0x2a4   :  { %2696 = vmatprep.subr.bf16.mxu1 %v2695_v39  ;;  %v2707_v17 = vpack.c.bf16 %v1054_v11, %v1053_v23  ;;  %v1199_v11 = vld [vmem:[#allocation9 + $0x30] sm:$0xff] }
 0x2a6   :  { %2501 = vmatmul.mubr.msk.f32.vlgmr.msra.gmra.mrb[6].mxu1 %vm219_vm7, %v3375_v44 }
 0x2a7   :  { %2503 = vmatprep.mubr.msk.f32.mxu1 %vm219_vm7, %v3380_v48  ;;  %2698 = vmatpush3.bf16.msra.mxu1 %v2695_v39 }
 0x2aa   :  { %2504 = vmatmul.mubr.msk.f32.gmra.mrb[8].mxu1 %vm219_vm7, %v3386_v52 }
 0x2ab   :  { %2506 = vmatprep.mubr.msk.f32.mxu1 %vm219_vm7, %v3392_v56 }
 0x2ae   :  { %2507 = vmatmul.mubr.msk.f32.gmra.mrb[10].mxu1 %vm219_vm7, %v3398_v60 }
 0x379   :  { %v2502_v38 = vpop.f32.mrb[6].mxu1 }
 0x37a   :  { %v926_v51 = vsub.f32 %v3467_v46, %v2502_v38  ;;  %v896_v22 = vpop.f32.mrb[7].mxu1  ;;  %v1057_v38 = vld [vmem:[#allocation8 + $0x50] sm:$0xff] }
 0x37b   :  { %v925_v26 = vsub.f32 %v3470_v49, %v896_v22 }
 0x37c   :  { %v933_v47 = vmul.f32 1.442695, %v926_v51  ;;  %v1058_v51 = vld [vmem:[#allocation8 + $0x58] sm:$0xff] }
 0x37d   :  { %v931_v61 = vmul.f32 1.442695, %v925_v26  ;;  %v2505_v55 = vpop.f32.mrb[8].mxu1  ;;  %v2715_v22 = vpack.c.bf16 %v1058_v51, %v1057_v38  ;;  %v1059_v26 = vld [vmem:[#allocation8 + $0x60] sm:$0xff]  ;;  %v1203_v38 = vld [vmem:[#allocation9 + $0x50] sm:$0xff] }
 0x37e   :  { %2928 = vpow2.f32 %v933_v47  ;;  %v928_v8 = vsub.f32 %v3481_v59, %v2505_v55  ;;  %v906_v27 = vpop.f32.mrb[9].mxu1  ;;  %v1060_v47 = vld [vmem:[#allocation8 + $0x68] sm:$0xff]  ;;  %v1061_v55 = vld [vmem:[#allocation8 + $0x70] sm:$0xff] }
 0x37f   :  { %2930 = vpow2.f32 %v931_v61  ;;  %v927_v43 = vsub.f32 %v3484_v62, %v906_v27  ;;  %v2719_v61 = vpack.c.bf16 %v1060_v47, %v1059_v26  ;;  %v1205_v47 = vld [vmem:[#allocation9 + $0x60] sm:$0xff] }
 0x380   :  { %v937_v63 = vmul.f32 1.442695, %v928_v8  ;;  %v1062_v8 = vld [vmem:[#allocation8 + $0x78] sm:$0xff] }
 0x381   :  { %v935_v58 = vmul.f32 1.442695, %v927_v43  ;;  %v2508_v36 = vpop.f32.mrb[10].mxu1  ;;  %v2723_v27 = vpack.c.bf16 %v1062_v8, %v1061_v55  ;;  %v1207_v8 = vld [vmem:[#allocation9 + $0x70] sm:$0xff] }
 0x382   :  { %2932 = vpow2.f32 %v937_v63  ;;  %v930_v20 = vsub.f32 %v3493_v3, %v2508_v36  ;;  %v916_v46 = vpop.f32.mrb[11].mxu1 }
 0x383   :  { %2934 = vpow2.f32 %v935_v58  ;;  %v929_v49 = vsub.f32 %v3496_v5, %v916_v46 }
 0x384   :  { %v941_v13 = vmul.f32 1.442695, %v930_v20 }
 0x385   :  { %v939_v30 = vmul.f32 1.442695, %v929_v49 }
 0x386   :  { %2936 = vpow2.f32 %v941_v13 }
 0x387   :  { %2938 = vpow2.f32 %v939_v30 }
 0x388   :  { %v2929_v32 = vpop.eup %2928 }
 0x389   :  { %v2931_v59 = vpop.eup %2930  ;;  %v944_v50 = vmul.f32 %v2929_v32, %v3456_v37 }
 0x38a   :  { %v943_v62 = vmul.f32 %v2931_v59, %v3461_v42  ;;  %v2685_v28 = vpack.c.bf16 %v2929_v32, %v2931_v59 }
 0x38c   :  { %v2933_v21 = vpop.eup %2932  ;;  %v2683_v45 = vpack.c.bf16 %v944_v50, %v943_v62 }
 0x38d   :  { %v2935_v9 = vpop.eup %2934  ;;  %v946_v3 = vmul.f32 %v2933_v21, %v3473_v53  ;;  %v1049_v53 = vld [vmem:[#allocation8 + $0x10] sm:$0xff] }
 0x38e   :  { %2684 = vmatprep.subr.bf16.mxu0 %v2683_v45  ;;  %v945_v40 = vmul.f32 %v2935_v9, %v3477_v57  ;;  %v2689_v5 = vpack.c.bf16 %v2933_v21, %v2935_v9  ;;  %v1050_v57 = vld [vmem:[#allocation8 + $0x18] sm:$0xff] }
 0x38f   :  { %2686 = vmatpush1.bf16.msra.mxu0 %v2685_v28 }
 0x390   :  { %v2937_v54 = vpop.eup %2936  ;;  %v2687_v33 = vpack.c.bf16 %v946_v3, %v945_v40  ;;  %v1193_v40 = vld [vmem:[#allocation9] sm:$0xff] }
 0x391   :  { %v2939_v31 = vpop.eup %2938  ;;  %v948_v29 = vmul.f32 %v2937_v54, %v3487_v0  ;;  %v2699_v0 = vpack.c.bf16 %v1050_v57, %v1049_v53  ;;  %v1195_v57 = vld [vmem:[#allocation9 + $0x10] sm:$0xff] }
 0x392   :  { %2688 = vmatprep.subr.bf16.mxu0 %v2687_v33  ;;  %v947_v37 = vmul.f32 %v2939_v31, %v3490_v1  ;;  %v2693_v42 = vpack.c.bf16 %v2937_v54, %v2939_v31  ;;  %v1051_v1 = vld [vmem:[#allocation8 + $0x20] sm:$0xff] }
 0x393   :  { %2690 = vmatpush1.bf16.msra.mxu0 %v2689_v5  ;;  %2700 = vmatprep.subr.bf16.mxu1 %v2699_v0  ;;  %v2703_v35 = vpack.c.bf16 %v1052_v24, %v1051_v1  ;;  %v1194_v5 = vld [vmem:[#allocation9 + $0x8] sm:$0xff]  ;;  %v2325_v33 = vld [vmem:[%s3919_s13] ss:$0 sm:$0xff] }
 0x394   :  { %v2691_v25 = vpack.c.bf16 %v948_v29, %v947_v37  ;;  %2702 = vmatpush3.bf16.msra.mxu1 %v2699_v0  ;;  %v2727_v54 = vpack.c.bf16 %v1194_v5, %v1193_v40  ;;  %v1196_v0 = vld [vmem:[#allocation9 + $0x18] sm:$0xff]  ;;  %v1197_v24 = vld [vmem:[#allocation9 + $0x20] sm:$0xff] }
 0x395   :  { %2704 = vmatprep.subr.bf16.mxu1 %v2703_v35  ;;  %v2731_v1 = vpack.c.bf16 %v1196_v0, %v1195_v57  ;;  %v2327_v5 = vld [vmem:[%s3921_s15] ss:$0 sm:$0xff] }
 0x396   :  { %2692 = vmatprep.subr.bf16.mxu0 %v2691_v25  ;;  %v2328_v57 = vld [vmem:[%s3923_s17] ss:$0 sm:$0xff] }
 0x397   :  { %2694 = vmatpush1.bf16.msra.mxu0 %v2693_v42 }
 0x398   :  { %2706 = vmatpush3.bf16.msra.mxu1 %v2703_v35  ;;  %2728 = vmatprep.subr.bf16.mxu0 %v2727_v54  ;;  %v1198_v35 = vld [vmem:[#allocation9 + $0x28] sm:$0xff] }
 0x399   :  { %2708 = vmatprep.subr.bf16.mxu1 %v2707_v17  ;;  %v2735_v23 = vpack.c.bf16 %v1198_v35, %v1197_v24 }
 0x39a   :  { %2323 = vmatmul.mubr.msk.f32.vlgmr.msra.gmra.mrb[8].mxu0 %vm949_vm4, %v3312_v16 }
 0x39b   :  { %1026 = vmatprep.mubr.f32.mxu0 %v3988_v12  ;;  %v1056_v12 = vld [vmem:[#allocation8 + $0x48] sm:$0xff]  ;;  %2730 = vmatpush3.bf16.msra.mxu0 %v2727_v54 }
 0x39c   :  { %2710 = vmatpush3.bf16.msra.mxu1 %v2707_v17  ;;  %v2711_v39 = vpack.c.bf16 %v1056_v12, %v1055_v19  ;;  %2732 = vmatprep.subr.bf16.mxu0 %v2731_v1  ;;  %v1200_v17 = vld [vmem:[#allocation9 + $0x38] sm:$0xff]  ;;  %v1201_v12 = vld [vmem:[#allocation9 + $0x40] sm:$0xff] }
 0x39d   :  { %v2739_v19 = vpack.c.bf16 %v1200_v17, %v1199_v11 }
 0x39e   :  { %2324 = vmatmul.mubr.msk.f32.gmra.mrb[10].mxu0 %vm949_vm4, %v3318_v18  ;;  %2712 = vmatprep.subr.bf16.mxu1 %v2711_v39 }
 0x39f   :  { %2734 = vmatpush3.bf16.msra.mxu0 %v2731_v1 }
 0x3a0   :  { %2714 = vmatpush3.bf16.msra.mxu1 %v2711_v39  ;;  %2736 = vmatprep.subr.bf16.mxu0 %v2735_v23  ;;  %v1202_v39 = vld [vmem:[#allocation9 + $0x48] sm:$0xff] }
 0x3a1   :  { %2716 = vmatprep.subr.bf16.mxu1 %v2715_v22  ;;  %v2743_v51 = vpack.c.bf16 %v1202_v39, %v1201_v12 }
 0x3a3   :  { %2738 = vmatpush3.bf16.msra.mxu0 %v2735_v23 }
 0x3a4   :  { %2718 = vmatpush3.bf16.msra.mxu1 %v2715_v22  ;;  %2740 = vmatprep.subr.bf16.mxu0 %v2739_v19  ;;  %v1204_v22 = vld [vmem:[#allocation9 + $0x58] sm:$0xff] }
 0x3a5   :  { %2720 = vmatprep.subr.bf16.mxu1 %v2719_v61  ;;  %v2747_v26 = vpack.c.bf16 %v1204_v22, %v1203_v38 }
 0x3a7   :  { %2742 = vmatpush3.bf16.msra.mxu0 %v2739_v19 }
 0x3a8   :  { %2722 = vmatpush3.bf16.msra.mxu1 %v2719_v61  ;;  %v1206_v61 = vld [vmem:[#allocation9 + $0x68] sm:$0xff]  ;;  %2744 = vmatprep.subr.bf16.mxu0 %v2743_v51 }
 0x3a9   :  { %2724 = vmatprep.subr.bf16.mxu1 %v2723_v27  ;;  %v2751_v55 = vpack.c.bf16 %v1206_v61, %v1205_v47 }
 0x3ab   :  { %2746 = vmatpush3.bf16.msra.mxu0 %v2743_v51 }
 0x3ac   :  { %2726 = vmatpush3.bf16.msra.mxu1 %v2723_v27  ;;  %2748 = vmatprep.subr.bf16.mxu0 %v2747_v26  ;;  %v1208_v27 = vld [vmem:[#allocation9 + $0x78] sm:$0xff] }
 0x3af   :  { %2750 = vmatpush3.bf16.msra.mxu0 %v2747_v26 }
 0x3b0   :  { %2752 = vmatprep.subr.bf16.mxu0 %v2751_v55 }
 0x3b3   :  { %2754 = vmatpush3.bf16.msra.mxu0 %v2751_v55 }
 0x46d   :  { %v1022_v43 = vpop.f32.mrb[8].mxu0 }
 0x46e   :  { %v1033_v63 = vmax.f32 %v1022_v43, 1e-30  ;;  %v1024_v58 = vpop.f32.mrb[9].mxu0  ;;  %v2755_v43 = vpack.c.bf16 %v1208_v27, %v1207_v8 }
 0x470   :  { %2940 = vrcp.f32 %v1033_v63  ;;  %2756 = vmatprep.subr.bf16.mxu0 %v2755_v43 }
 0x471   :  { %v1028_v36 = vpop.f32.mrb[10].mxu0  ;;  %2758 = vmatpush3.bf16.msra.mxu0 %v2755_v43 }
 0x472   :  { %v1034_v20 = vmax.f32 %v1028_v36, 1e-30  ;;  %v1030_v46 = vpop.f32.mrb[11].mxu0 }
 0x474   :  { %2942 = vrcp.f32 %v1034_v20 }
 0x47a   :  { %v2941_v49 = vpop.eup %2940 }
 0x47b   :  { %v1037_v13 = vmul.f32 %v2941_v49, %v1033_v63 }
 0x47d   :  { %v1039_v30 = vsub.f32 2.0, %v1037_v13 }
 0x47e   :  { %v2943_v32 = vpop.eup %2942 }
 0x47f   :  { %v1041_v59 = vmul.f32 %v2941_v49, %v1039_v30  ;;  %v1038_v50 = vmul.f32 %v2943_v32, %v1034_v20 }
 0x481   :  { %v1043_v62 = vmul.f32 %v1041_v59, %v1024_v58  ;;  %v1040_v28 = vsub.f32 2.0, %v1038_v50 }
 0x483   :  { %v1045_v21 = vadd.f32 %v1043_v62, %v3409_v4  ;;  %v1042_v45 = vmul.f32 %v2943_v32, %v1040_v28 }
 0x485   :  { %v1044_v9 = vmul.f32 %v1042_v45, %v1030_v46  ;;  %2541 = vmatprep.mubr.f32.mxu1 %v1045_v21 }
 0x487   :  { %v1046_v3 = vadd.f32 %v1044_v9, %v3407_v2 }
 0x489   :  { %2542 = vmatmul.mubr.f32.vlgmr.msra.gmra.mrb[12].mxu1 %v1046_v3  ;;  %v2326_v3 = vld [vmem:[%s3920_s14] ss:$0 sm:$0xff] }
 0x55c   :  { %v2543_v31 = vpop.f32.mrb[12].mxu1 }
 0x55d   :  { %v1136_v29 = vpop.f32.mrb[13].mxu1  ;;  %v3602_v37 = vadd.f32 %v2543_v31, %v2325_v33 }
 0x55e   :  { %v3604_v4 = vadd.f32 %v2325_v33, %v1136_v29 }
 0x55f   :  { %v1148_v25 = vmul.f32 %v3309_v15, %v3602_v37 }
 0x560   :  { %v1147_v42 = vmul.f32 %v3309_v15, %v3604_v4 }
 0x561   :  { %v1156_v53 = vmul.f32 %v1148_v25, %v3602_v37 }
 0x562   :  { %1149 = vadd.xlane.f32.xlu0 %v1147_v42  ;;  %v1155_v2 = vmul.f32 %v1147_v42, %v3604_v4 }
 0x564   :  { %1157 = vadd.xlane.f32.xlu1 %v1155_v2 }
 0x566   :  { %1151 = vadd.xlane.f32.xlu0 %v1148_v25 }
 0x568   :  { %1159 = vadd.xlane.f32.xlu1 %v1156_v53 }
 0x5ef   :  { %v1150_v63 = vpop.xlane.xlu0 %1149 }
 0x5f0   :  { %v1153_v58 = vmul.f32 0.015625, %v1150_v63 }
 0x5f1   :  { %v1158_v36 = vpop.xlane.xlu1 %1157 }
 0x5f2   :  { %v1163_v20 = vmul.f32 %v1153_v58, %v1153_v58  ;;  %v1161_v46 = vmul.f32 0.015625, %v1158_v36  ;;  %v1167_v45 = vsub.f32 %v3604_v4, %v1153_v58 }
 0x5f3   :  { %v1152_v49 = vpop.xlane.xlu0 %1151 }
 0x5f4   :  { %v1165_v13 = vsub.f32 %v1161_v46, %v1163_v20  ;;  %v1154_v30 = vmul.f32 0.015625, %v1152_v49 }
 0x5f5   :  { %v1160_v32 = vpop.xlane.xlu1 %1159 }
 0x5f6   :  { %v1169_v59 = vadd.f32 1e-05, %v1165_v13  ;;  %v1164_v50 = vmul.f32 %v1154_v30, %v1154_v30  ;;  %v1162_v62 = vmul.f32 0.015625, %v1160_v32  ;;  %v1168_v54 = vsub.f32 %v3602_v37, %v1154_v30 }
 0x5f8   :  { %2944 = vrsqrt.f32 %v1169_v59  ;;  %v1166_v28 = vsub.f32 %v1162_v62, %v1164_v50 }
 0x5fa   :  { %v1170_v21 = vadd.f32 1e-05, %v1166_v28 }
 0x5fc   :  { %2946 = vrsqrt.f32 %v1170_v21 }
 0x602   :  { %v2945_v9 = vpop.eup %2944 }
 0x603   :  { %v1173_v40 = vmul.f32 %v2945_v9, %v1167_v45 }
 0x605   :  { %v1181_v33 = vmul.f32 %v2326_v3, %v1173_v40 }
 0x606   :  { %v2947_v31 = vpop.eup %2946 }
 0x607   :  { %v1174_v29 = vmul.f32 %v2947_v31, %v1168_v54  ;;  %v1189_v42 = vadd.f32 %v2327_v5, %v1181_v33 }
 0x609   :  { %v1182_v2 = vmul.f32 %v2326_v3, %v1174_v29  ;;  %v1191_v25 = vmax.f32 %v1189_v42, 0.0 }
 0x60b   :  { %v1190_v53 = vadd.f32 %v2327_v5, %v1182_v2  ;;  %2576 = vmatprep.mubr.f32.mxu0 %v1191_v25 }
 0x60d   :  { %v1192_v4 = vmax.f32 %v1190_v53, 0.0 }
 0x60f   :  { %2577 = vmatmul.mubr.f32.vlgmr.msra.gmra.mrb[12].mxu0 %v1192_v4 }
 0x6e2   :  { %v2578_v0 = vpop.f32.mrb[12].mxu0 }
 0x6e3   :  { %v1288_v1 = vadd.f32 %v2578_v0, %v2328_v57   ;;  %v1282_v24 = vpop.f32.mrb[13].mxu0 }
 0x6e4   :  { %v1283_v35 = vadd.f32 %v2328_v57, %v1282_v24  }
 0x6e5 LB: > { %v3989_v14 = vld [vmem:[#allocation17_spill] sm:$0xff]  ;;  %3990 = vst [vmem:[#allocation32_spill] sm:$0xff] %v3113_v1  ;;  %3991 = vst [vmem:[#allocation33_spill] sm:$0xff] %v3117_v35  ;;  %v3992_v34 = vld [vmem:[#allocation18_spill] sm:$0xff]  ;;  %s1299_s2 = scalar_lea.vmem %s3915_s9, %s3121_s21  ;;  %s1301_s22 = scalar_lea.vmem %s3916_s10, %s3121_s21  ;;  %v3113_v1 = vphi %v1288_v1, %v4020_v1   ;;  %s3121_s21 = sphi %s3627_s21, %s1296_s21   ;;  %v3117_v35 = vphi %v1283_v35, %v4021_v35  }
 0x6e6   : > { %2583 = vmatprep.mubr.msk.f32.mxu0 %vm219_vm7, %v3992_v34  ;;  %v1303_v37 = vmul.f32 %v3117_v35, %v3989_v14  ;;  %v1304_v23 = vmul.f32 %v3113_v1, %v3989_v14  ;;  %v2329_v20 = vld [vmem:[%s1299_s2] ss:$0 sm:$0xff]  ;;  %v3993_v7 = vld [vmem:[#allocation20_spill] sm:$0xff]  ;;  %v3994_v6 = vld [vmem:[#allocation19_spill] sm:$0xff]  ;;  %s1349_s6 = sld [smem:[#allocation4 + %s3121_s21]]  ;;  %s3723_s11 = smov 0  }
 0x6e7   : > { %v2330_v32 = vld [vmem:[%s1301_s22] ss:$0 sm:$0xff]  ;;  %v3995_v10 = vld [vmem:[#allocation21_spill] sm:$0xff]  ;;  %v3997_v40 = vld [vmem:[#allocation23_spill] sm:$0xff] }
 0x6e8   : > { %1305 = vadd.xlane.f32.xlu0 %v1303_v37  ;;  %v1311_v11 = vmul.f32 %v3117_v35, %v1303_v37  ;;  %v1312_v17 = vmul.f32 %v3113_v1, %v1304_v23  ;;  %v3996_v3 = vld [vmem:[#allocation22_spill] sm:$0xff]  ;;  %v3998_v54 = vld [vmem:[#allocation24_spill] sm:$0xff]  ;;  %v3999_v29 = vld [vmem:[#allocation25_spill] sm:$0xff] }
 0x6e9   : > { %v4000_v0 = vld [vmem:[#allocation26_spill] sm:$0xff] }
 0x6ea   : > { %1313 = vadd.xlane.f32.xlu1 %v1311_v11  ;;  %v4001_v11 = vld [vmem:[#allocation27_spill] sm:$0xff] }
 0x6ec   : > { %1307 = vadd.xlane.f32.xlu0 %v1304_v23  ;;  %v1457_v25 = vstv %s1349_s6 }
 0x6ee   : > { %1315 = vadd.xlane.f32.xlu1 %v1312_v17 }
 0x775   : > { %v1306_v19 = vpop.xlane.xlu0 %1305 }
 0x776   : > { %v1309_v12 = vmul.f32 0.03125, %v1306_v19 }
 0x777   : > { %v1314_v39 = vpop.xlane.xlu1 %1313 }
 0x778   : > { %v1319_v38 = vmul.f32 %v1309_v12, %v1309_v12  ;;  %v1317_v51 = vmul.f32 0.03125, %v1314_v39  ;;  %v1323_v58 = vsub.f32 %v3117_v35, %v1309_v12 }
 0x779   : > { %v1308_v22 = vpop.xlane.xlu0 %1307 }
 0x77a   : > { %v1321_v26 = vsub.f32 %v1317_v51, %v1319_v38  ;;  %v1310_v47 = vmul.f32 0.03125, %v1308_v22 }
 0x77b   : > { %v1316_v61 = vpop.xlane.xlu1 %1315 }
 0x77c   : > { %v1325_v55 = vadd.f32 1e-05, %v1321_v26  ;;  %v1320_v8 = vmul.f32 %v1310_v47, %v1310_v47  ;;  %v1318_v27 = vmul.f32 0.03125, %v1316_v61  ;;  %v1324_v49 = vsub.f32 %v3113_v1, %v1310_v47  ;;  %v4002_v26 = vld [vmem:[#allocation28_spill] sm:$0xff] }
 0x77e   : > { %2948 = vrsqrt.f32 %v1325_v55  ;;  %v1322_v43 = vsub.f32 %v1318_v27, %v1320_v8  ;;  %v4003_v8 = vld [vmem:[#allocation29_spill] sm:$0xff] }
 0x780   : > { %v1326_v63 = vadd.f32 1e-05, %v1322_v43 }
 0x782   : > { %2950 = vrsqrt.f32 %v1326_v63 }
 0x788   : > { %v2949_v36 = vpop.eup %2948 }
 0x789   : > { %v1329_v46 = vmul.f32 %v2949_v36, %v1323_v58 }
 0x78b   : > { %v1337_v13 = vmul.f32 %v2329_v20, %v1329_v46 }
 0x78c   : > { %v2951_v30 = vpop.eup %2950 }
 0x78d   : > { %v1330_v59 = vmul.f32 %v2951_v30, %v1324_v49  ;;  %v3656_v62 = vadd.f32 %v2330_v32, %v1337_v13  ;;  %v3719_v30 = vmov -1e+30  }
 0x78f   : > { %v1338_v50 = vmul.f32 %v2329_v20, %v1330_v59  ;;  %v3953_v21 = vmax.f32 %v3656_v62, 0.0 }
 0x791   : > { %v3658_v28 = vadd.f32 %v2330_v32, %v1338_v50  ;;  %v3721_v32 = vmov -1e+30  }
 0x793   : > { %v3952_v45 = vmax.f32 %v3658_v28, 0.0 }
 0x795   : > { %v2759_v9 = vpack.c.bf16 %v3952_v45, %v3953_v21 }
 0x797   : > { %2760 = vmatprep.subr.bf16.mxu0 %v2759_v9 }
 0x798   : > { %2762 = vmatpush3.bf16.msra.mxu0 %v2759_v9 }
 0x79b   : > { %2584 = vmatmul.mubr.msk.f32.vlgmr.msra.gmra.mrb[0].mxu0 %vm219_vm7, %v3993_v7 }
 0x79c   : > { %2586 = vmatprep.mubr.msk.f32.mxu0 %vm219_vm7, %v3994_v6 }
 0x79f   : > { %2587 = vmatmul.mubr.msk.f32.gmra.mrb[2].mxu0 %vm219_vm7, %v3995_v10 }
 0x7a0   : > { %2589 = vmatprep.mubr.msk.f32.mxu0 %vm219_vm7, %v3996_v3 }
 0x7a3   : > { %2590 = vmatmul.mubr.msk.f32.gmra.mrb[4].mxu0 %vm219_vm7, %v3997_v40 }
 0x86e   : > { %v2585_v5 = vpop.f32.mrb[0].mxu0 }
 0x86f   : > { %v1422_v33 = vadd.f32 %v2585_v5, %v3998_v54  ;;  %v1416_v31 = vpop.f32.mrb[1].mxu0 }
 0x870   : > { %v1417_v42 = vadd.f32 %v1416_v31, %v3999_v29 }
 0x871   : > { %v1446_v2 = vmax.f32 %v1422_v33, 0.0 }
 0x872   : > { %v1445_v53 = vmax.f32 %v1417_v42, 0.0  ;;  %v2588_v4 = vpop.f32.mrb[2].mxu0 }
 0x873   : > { %v3679_v57 = vadd.f32 1e-07, %v1446_v2  ;;  %v1432_v24 = vadd.f32 %v2588_v4, %v4000_v0  ;;  %v1426_v37 = vpop.f32.mrb[3].mxu0 }
 0x874   : > { %v3682_v23 = vadd.f32 1e-07, %v1445_v53  ;;  %v1427_v17 = vadd.f32 %v1426_v37, %v4001_v11 }
 0x875   : > { %v3686_v19 = vmul.f32 %v1457_v25, %v3679_v57  ;;  %v1448_v12 = vmax.f32 %v1432_v24, 0.0 }
 0x876   : > { %v3689_v39 = vmul.f32 %v1457_v25, %v3682_v23  ;;  %v1447_v38 = vmax.f32 %v1427_v17, 0.0  ;;  %v2591_v51 = vpop.f32.mrb[4].mxu0 }
 0x877   : > { %1465 = vst [vmem:[#allocation2 + $0x8] sm:$0xff] %v3686_v19  ;;  %v3692_v22 = vadd.f32 1e-07, %v1448_v12  ;;  %v1442_v47 = vadd.f32 %v2591_v51, %v4002_v26  ;;  %v1436_v61 = vpop.f32.mrb[5].mxu0 }
 0x878   : > { %1464 = vst [vmem:[#allocation2] sm:$0xff] %v3689_v39  ;;  %v3696_v55 = vadd.f32 1e-07, %v1447_v38  ;;  %v1437_v27 = vadd.f32 %v1436_v61, %v4003_v8 }
 0x879   : > { %v3700_v43 = vmul.f32 %v1457_v25, %v3692_v22  ;;  %v1450_v63 = vmax.f32 %v1442_v47, 0.0 }
 0x87a   : > { %v3703_v58 = vmul.f32 %v1457_v25, %v3696_v55  ;;  %v1449_v36 = vmax.f32 %v1437_v27, 0.0 }
 0x87b   : > { %1467 = vst [vmem:[#allocation2 + $0x18] sm:$0xff] %v3700_v43  ;;  %v3706_v20 = vadd.f32 1e-07, %v1450_v63 }
 0x87c   : > { %1466 = vst [vmem:[#allocation2 + $0x10] sm:$0xff] %v3703_v58  ;;  %v3709_v46 = vadd.f32 1e-07, %v1449_v36 }
 0x87d   : > { %v3712_v49 = vmul.f32 %v1457_v25, %v3706_v20 }
 0x87e   : > { %v3715_v13 = vmul.f32 %v1457_v25, %v3709_v46 }
 0x87f   : > { %1469 = vst [vmem:[#allocation2 + $0x28] sm:$0xff] %v3712_v49 }
 0x880   : > { %1468 = vst [vmem:[#allocation2 + $0x20] sm:$0xff] %v3715_v13 }
 0x881 LB: >> { %s2337_s24 = sshll.u32 %s3133_s11, 3  ;;  %v4004_v50 = vld [vmem:[#allocation16_spill] sm:$0xff]  ;;  %v4006_v40 = vld [vmem:[#allocation30_spill] sm:$0xff]  ;;  %v4013_v26 = vld [vmem:[#allocation31_spill] sm:$0xff]  ;;  %s1475_s11 = sadd.s32 1, %s3133_s11   ;;  %s3133_s11 = sphi %s3723_s11, %s1475_s11   ;;  %v3129_v32 = vphi %v3721_v32, %v4015_v32   ;;  %v3125_v30 = vphi %v3719_v30, %v4014_v30  }
 0x882   : >> { %s1481_s8 = scalar_lea.vmem [#allocation3], %s2337_s24  ;;  %v4005_v9 = vsub.s32 1, %v4004_v50  ;;  %v4007_v54 = vsub.s32 2, %v4004_v50  ;;  %v4008_v31 = vsub.s32 3, %v4004_v50  ;;  %v4009_v42 = vsub.s32 4, %v4004_v50  ;;  %s1479_s12 = scalar_lea.vmem [#allocation2], %s2337_s24 }
 0x883   : >> { %v1482_v59 = vld [vmem:[%s1481_s8] sm:$0xff]  ;;  %v4010_v25 = vsub.s32 5, %v4004_v50  ;;  %v4011_v4 = vsub.s32 6, %v4004_v50  ;;  %v4012_v24 = vsub.s32 7, %v4004_v50  ;;  %p1472_p8 = scmp.ge.s32.totalorder %s1475_s11, 6  }
 0x884   : >> { %v1547_v3 = vrot.slane %v1482_v59, %v4005_v9  ;;  %v1536_v5 = vrot.slane %v1482_v59, %v4006_v40  ;;  %v1558_v33 = vrot.slane %v1482_v59, %v4007_v54  ;;  %v1569_v29 = vrot.slane %v1482_v59, %v4008_v31  ;;  %2596 = vmatprep.mubr.msk.f32.mxu1 (%p1472_p8), %vm219_vm7, %v3370_v41  ;;  %s2346_s1 = sshll.u32 (%p1472_p8), %s3121_s21, 7  ;;  %s1921_s30 = scalar_lea.vmem (%p1472_p8), %s3919_s13, %s3121_s21 }
 0x885   : >> { %v1580_v2 = vrot.slane %v1482_v59, %v4009_v42  ;;  %v1591_v53 = vrot.slane %v1482_v59, %v4010_v25  ;;  %v1602_v0 = vrot.slane %v1482_v59, %v4011_v4  ;;  %v1613_v37 = vrot.slane %v1482_v59, %v4012_v24  ;;  %s3788_s25 = scalar_lea.vmem (%p1472_p8), [#allocation8], %s2346_s1  ;;  %s3828_s4 = scalar_lea.vmem (%p1472_p8), [#allocation9], %s2346_s1 }
 0x886   : >> { %1549 = vbcast.lane.b32.xlu1 %v1547_v3, 256  ;;  %1538 = vbcast.lane.b32.xlu0 %v1536_v5, 256  ;;  %s2004_s20 = scalar_lea.vmem (%p1472_p8), %s3920_s14, %s3121_s21  ;;  %s2006_s0 = scalar_lea.vmem (%p1472_p8), %s3921_s15, %s3121_s21 }
 0x887   : >> { %v1480_v12 = vld [vmem:[%s1479_s12] sm:$0xff]  ;;  %s2071_s23 = scalar_lea.vmem (%p1472_p8), %s3923_s17, %s3121_s21  ;;  %s1296_s21 = sadd.s32 (%p1472_p8), 1, %s3121_s21  }
 0x888   : >> { %v1491_v47 = vrot.slane %v1480_v12, %v4013_v26  ;;  %v1484_v61 = vcombine.high %v1480_v12, %v1480_v12  ;;  %p1293_p9 = scmp.ge.s32.totalorder (%p1472_p8), %s1296_s21, 3  }
 0x88a   : >> { %1553 = vbcast.lane.b32.xlu1 %v1547_v3, 264  ;;  %1542 = vbcast.lane.b32.xlu0 %v1536_v5, 264  ;;  %v1499_v63 = vcombine.high %v1491_v47, %v1491_v47  ;;  %v1498_v36 = vrot.slane %v1484_v61, %v4013_v26  ;;  %v1507_v9 = vrot.slane %v1491_v47, %v4013_v26 }
 0x88c   : >> { %v1521_v3 = vrot.slane %v1499_v63, %v4013_v26  ;;  %v1500_v5 = vcombine.high %v1498_v36, %v1498_v36  ;;  %v1529_v54 = vcombine.high %v1507_v9, %v1507_v9  ;;  %v1624_v24 = vrot.slane %v1507_v9, %v4006_v40 }
 0x88e   : >> { %1564 = vbcast.lane.b32.xlu1 %v1558_v33, 264  ;;  %1560 = vbcast.lane.b32.xlu0 %v1558_v33, 256  ;;  %v1531_v33 = vcombine.high %v1521_v3, %v1521_v3  ;;  %v1632_v25 = vrot.slane %v1529_v54, %v4006_v40  ;;  %v1628_v61 = vrot.slane %v1521_v3, %v4006_v40 }
 0x892   : >> { %1575 = vbcast.lane.b32.xlu1 %v1569_v29, 264  ;;  %1571 = vbcast.lane.b32.xlu0 %v1569_v29, 256  ;;  %v1514_v29 = vrot.slane %v1498_v36, %v4013_v26 }
 0x894   : >> { %v1530_v4 = vcombine.high %v1514_v29, %v1514_v29 }
 0x896   : >> { %1586 = vbcast.lane.b32.xlu1 %v1580_v2, 264  ;;  %1582 = vbcast.lane.b32.xlu0 %v1580_v2, 256  ;;  %v1528_v2 = vrot.slane %v1500_v5, %v4013_v26  ;;  %v1648_v54 = vrot.slane %v1530_v4, %v4006_v40 }
 0x898   : >> { %v1644_v63 = vrot.slane %v1528_v2, %v4006_v40 }
 0x89a   : >> { %1597 = vbcast.lane.b32.xlu1 %v1591_v53, 264  ;;  %1593 = vbcast.lane.b32.xlu0 %v1591_v53, 256  ;;  %v1636_v53 = vrot.slane %v1531_v33, %v4006_v40 }
 0x89e   : >> { %1608 = vbcast.lane.b32.xlu1 %v1602_v0, 264  ;;  %1604 = vbcast.lane.b32.xlu0 %v1602_v0, 256  ;;  %v1532_v0 = vcombine.high %v1528_v2, %v1528_v2 }
 0x8a0   : >> { %v1652_v33 = vrot.slane %v1532_v0, %v4006_v40 }
 0x8a2   : >> { %1619 = vbcast.lane.b32.xlu1 %v1613_v37, 264  ;;  %1615 = vbcast.lane.b32.xlu0 %v1613_v37, 256  ;;  %v1640_v37 = vrot.slane %v1514_v29, %v4006_v40 }
 0x8f8   : >> { %v1550_v11 = vpop.permute.xlu1 %1549  ;;  %v1539_v17 = vpop.permute.xlu0 %1538 }
 0x8f9   : >> { %v1661_v6 = vadd.f32 %v1624_v24, %v1539_v17  ;;  %v1663_v34 = vadd.f32 %v1628_v61, %v1550_v11 }
 0x8fc   : >> { %v1554_v38 = vpop.permute.xlu1 %1553  ;;  %v1543_v51 = vpop.permute.xlu0 %1542 }
 0x8fd   : >> { %v1662_v7 = vadd.f32 %v1624_v24, %v1543_v51  ;;  %v1664_v14 = vadd.f32 %v1628_v61, %v1554_v38 }
 0x900   : >> { %v1565_v8 = vpop.permute.xlu1 %1564  ;;  %v1561_v27 = vpop.permute.xlu0 %1560 }
 0x901   : >> { %v1666_v36 = vadd.f32 %v1632_v25, %v1565_v8  ;;  %v1665_v45 = vadd.f32 %v1632_v25, %v1561_v27 }
 0x903   : >> { %v1684_v1 = vmax.f32 %v1662_v7, %v1666_v36  ;;  %v1677_v2 = vmax.f32 %v1661_v6, %v1665_v45  ;;  %v3143_v7 = vmov (%p1472_p8), 0.0  }
 0x904   : >> { %v1576_v50 = vpop.permute.xlu1 %1575  ;;  %v1572_v59 = vpop.permute.xlu0 %1571  ;;  %1876 = vmatprep.mubr.f32.mxu0 (%p1472_p8), %v3143_v7 }
 0x905   : >> { %v1668_v21 = vadd.f32 %v1636_v53, %v1576_v50  ;;  %v1667_v5 = vadd.f32 %v1636_v53, %v1572_v59 }
 0x907   : >> { %v1685_v8 = vmax.f32 %v1664_v14, %v1668_v21  ;;  %v1678_v27 = vmax.f32 %v1663_v34, %v1667_v5 }
 0x908   : >> { %v1587_v31 = vpop.permute.xlu1 %1586  ;;  %v1583_v42 = vpop.permute.xlu0 %1582 }
 0x909   : >> { %v1670_v10 = vadd.f32 %v1640_v37, %v1587_v31  ;;  %v1669_v9 = vadd.f32 %v1640_v37, %v1583_v42 }
 0x90b   : >> { %v1686_v25 = vmax.f32 %v1684_v1, %v1670_v10  ;;  %v1679_v53 = vmax.f32 %v1677_v2, %v1669_v9  ;;  %v1905_v10 = vld [vmem:[%s3788_s25] sm:$0xff] (%p1472_p8)  ;;  %v1906_v1 = vld [vmem:[%s3788_s25 + $0x8] sm:$0xff] (%p1472_p8) }
 0x90c   : >> { %v1598_v12 = vpop.permute.xlu1 %1597  ;;  %v1594_v47 = vpop.permute.xlu0 %1593 }
 0x90d   : >> { %v1672_v35 = vadd.f32 %v1644_v63, %v1598_v12  ;;  %v1671_v3 = vadd.f32 %v1644_v63, %v1594_v47 }
 0x90f   : >> { %v1687_v17 = vmax.f32 %v1685_v8, %v1672_v35  ;;  %v1680_v51 = vmax.f32 %v1678_v27, %v1671_v3  ;;  %v2779_v35 = vpack.c.bf16 (%p1472_p8), %v1906_v1, %v1905_v10  ;;  %v1916_v10 = vld [vmem:[%s3788_s25 + $0x58] sm:$0xff] (%p1472_p8) }
 0x910   : >> { %v1609_v26 = vpop.permute.xlu1 %1608  ;;  %v1605_v29 = vpop.permute.xlu0 %1604 }
 0x911   : >> { %v1674_v50 = vadd.f32 %v1648_v54, %v1609_v26  ;;  %v1673_v59 = vadd.f32 %v1648_v54, %v1605_v29 }
 0x913   : >> { %v1688_v24 = vmax.f32 %v1686_v25, %v1674_v50  ;;  %v1681_v37 = vmax.f32 %v1679_v53, %v1673_v59 }
 0x914   : >> { %v1620_v4 = vpop.permute.xlu1 %1619  ;;  %v1616_v0 = vpop.permute.xlu0 %1615 }
 0x915   : >> { %v1676_v31 = vadd.f32 %v1652_v33, %v1620_v4  ;;  %v1675_v42 = vadd.f32 %v1652_v33, %v1616_v0 }
 0x917   : >> { %v1689_v11 = vmax.f32 %v1687_v17, %v1676_v31  ;;  %v1682_v38 = vmax.f32 %v1680_v51, %v1675_v42  ;;  %1474 = sbr.rel (!%p1472_p8) target bundleno = 2177 (0x881), region = 148 }
 0x919   : >> { %v1690_v12 = vmax.f32 %v1688_v24, %v1689_v11  ;;  %v1683_v47 = vmax.f32 %v1681_v37, %v1682_v38  ;;  %v1910_v37 = vld [vmem:[%s3788_s25 + $0x28] sm:$0xff] (%p1472_p8)  ;;  %v1911_v38 = vld [vmem:[%s3788_s25 + $0x30] sm:$0xff] (%p1472_p8) }
 0x91b   : >> { %v1692_v6 = vmax.f32 %v3125_v30, %v1690_v12   ;;  %v1691_v14 = vmax.f32 %v3129_v32, %v1683_v47   ;;  %v1912_v12 = vld [vmem:[%s3788_s25 + $0x38] sm:$0xff] (%p1472_p8) }
 0x91c   : > { %v2791_v47 = vpack.c.bf16 (%p1472_p8), %v1912_v12, %v1911_v38  ;;  %v2062_v38 = vld [vmem:[%s3828_s4 + $0x38] sm:$0xff] (%p1472_p8) }
 0x91d   : >> { %v4014_v30 = vmov %v1692_v6  ;;  %v4015_v32 = vmov %v1691_v14  ;;  %v2763_v34 = vpack.c.bf16 (%p1472_p8), %v1692_v6, %v1691_v14  ;;  %v1913_v6 = vld [vmem:[%s3788_s25 + $0x40] sm:$0xff] (%p1472_p8)  ;;  %v1914_v14 = vld [vmem:[%s3788_s25 + $0x48] sm:$0xff] (%p1472_p8) }
 0x91e   :  { %s3144_s21 = smov (%p1293_p9), [#allocation11]  }
 0x91f   : > { %2764 = vmatprep.subr.bf16.mxu1 %v2763_v34  ;;  %s2211_s22 = sshll.u32 (%p1293_p9), %s3144_s21, 4  ;;  %s2212_s22 = int_to_ptr.vmem [resolvable:$true] %s2211_s22 }
 0x920   : > { %2766 = vmatpush3.bf16.msra.mxu1 %v2763_v34  ;;  %v2795_v34 = vpack.c.bf16 %v1914_v14, %v1913_v6  ;;  %v2064_v6 = vld [vmem:[%s3828_s4 + $0x48] sm:$0xff]  ;;  %v2065_v14 = vld [vmem:[%s3828_s4 + $0x50] sm:$0xff]  ;;  %p3038_p11 = scmp.lt.s32.totalorder (%p1293_p9), %s2212_s22, %s2212_s22 }
 0x921   : > { %2780 = vmatprep.subr.bf16.mxu1 %v2779_v35 }
 0x923   : > { %2597 = vmatmul.mubr.msk.f32.vlgmr.msra.gmra.mrb[0].mxu1 %vm219_vm7, %v3375_v44 }
 0x924   : > { %2599 = vmatprep.mubr.msk.f32.mxu1 %vm219_vm7, %v3380_v48  ;;  %2782 = vmatpush3.bf16.msra.mxu1 %v2779_v35  ;;  %v1917_v35 = vld [vmem:[%s3788_s25 + $0x60] sm:$0xff] }
 0x927   : > { %2600 = vmatmul.mubr.msk.f32.gmra.mrb[2].mxu1 %vm219_vm7, %v3386_v52  ;;  %v2351_v52 = vld [vmem:[%s3915_s9] ss:$0 sm:$0xff] (%p1293_p9)  ;;  %s3033_s9 = scalar_lea.vmem (%p1293_p9), %s2212_s22, 256 }
 0x928   : > { %2602 = vmatprep.mubr.msk.f32.mxu1 %vm219_vm7, %v3392_v56  ;;  %p3034_p10 = scmp.ne.s32.totalorder (%p1293_p9), %s2212_s22, %s3033_s9  ;;  %p3039_p12 = scmp.lt.s32.totalorder (%p1293_p9), %s3033_s9, %s3033_s9 }
 0x92a   :  { %p3040_p13 = por (%p1293_p9), %p3039_p12, %p3038_p11 }
 0x92b   : > { %2603 = vmatmul.mubr.msk.f32.gmra.mrb[4].mxu1 %vm219_vm7, %v3398_v60  ;;  %v2352_v60 = vld [vmem:[%s3916_s10] ss:$0 sm:$0xff] (%p1293_p9) }
 0x92c   :  { %p3041_p0 = pnand (%p1293_p9), %p3040_p13, %p3034_p10 }
 0x9f6   : > { %v2598_v21 = vpop.f32.mrb[0].mxu1 }
 0x9f7   : > { %v1789_v45 = vsub.f32 %v3686_v19, %v2598_v21  ;;  %v1759_v30 = vpop.f32.mrb[1].mxu1  ;;  %v1918_v21 = vld [vmem:[%s3788_s25 + $0x68] sm:$0xff] }
 0x9f8   : > { %v1788_v32 = vsub.f32 %v3689_v39, %v1759_v30  ;;  %v1919_v30 = vld [vmem:[%s3788_s25 + $0x70] sm:$0xff] }
 0x9f9   : > { %v1796_v26 = vmul.f32 1.442695, %v1789_v45  ;;  %v2803_v45 = vpack.c.bf16 %v1918_v21, %v1917_v35  ;;  %v2068_v35 = vld [vmem:[%s3828_s4 + $0x68] sm:$0xff] }
 0x9fa   : > { %v1794_v61 = vmul.f32 1.442695, %v1788_v32  ;;  %v2601_v63 = vpop.f32.mrb[2].mxu1  ;;  %v1920_v32 = vld [vmem:[%s3788_s25 + $0x78] sm:$0xff] }
 0x9fb   : > { %2953 = vpow2.f32 %v1796_v26  ;;  %v1791_v36 = vsub.f32 %v3700_v43, %v2601_v63  ;;  %v1769_v5 = vpop.f32.mrb[3].mxu1  ;;  %v2807_v26 = vpack.c.bf16 %v1920_v32, %v1919_v30  ;;  %v2070_v30 = vld [vmem:[%s3828_s4 + $0x78] sm:$0xff] }
 0x9fc   : > { %2955 = vpow2.f32 %v1794_v61  ;;  %v1790_v54 = vsub.f32 %v3703_v58, %v1769_v5 }
 0x9fd   : > { %v1800_v33 = vmul.f32 1.442695, %v1791_v36 }
 0x9fe   : > { %v1798_v9 = vmul.f32 1.442695, %v1790_v54  ;;  %v2604_v29 = vpop.f32.mrb[4].mxu1 }
 0x9ff   : > { %2957 = vpow2.f32 %v1800_v33  ;;  %v1793_v3 = vsub.f32 %v3712_v49, %v2604_v29  ;;  %v1779_v19 = vpop.f32.mrb[5].mxu1 }
 0xa00   : > { %2959 = vpow2.f32 %v1798_v9  ;;  %v1792_v39 = vsub.f32 %v3715_v13, %v1779_v19 }
 0xa01   : > { %v1804_v2 = vmul.f32 1.442695, %v1793_v3 }
 0xa02   : > { %v1802_v8 = vmul.f32 1.442695, %v1792_v39 }
 0xa03   : > { %2961 = vpow2.f32 %v1804_v2 }
 0xa04   : > { %2963 = vpow2.f32 %v1802_v8 }
 0xa05   : > { %v2954_v27 = vpop.eup %2953 }
 0xa06   : > { %v2956_v43 = vpop.eup %2955  ;;  %v1807_v50 = vmul.f32 %v2954_v27, %v3679_v57 }
 0xa07   : > { %v1806_v58 = vmul.f32 %v2956_v43, %v3682_v23  ;;  %v2769_v59 = vpack.c.bf16 %v2954_v27, %v2956_v43  ;;  %v4016_v43 = vmax.f32 %v3656_v62, 0.0  ;;  %v2347_v62 = vld [vmem:[%s1921_s30] ss:$0 sm:$0xff] }
 0xa09   : > { %v2958_v25 = vpop.eup %2957  ;;  %v2767_v53 = vpack.c.bf16 %v1807_v50, %v1806_v58 }
 0xa0a   : > { %v2960_v4 = vpop.eup %2959  ;;  %v1809_v49 = vmul.f32 %v2958_v25, %v3692_v22 }
 0xa0b   : > { %2768 = vmatprep.subr.bf16.mxu0 %v2767_v53  ;;  %v1808_v0 = vmul.f32 %v2960_v4, %v3696_v55  ;;  %v2773_v13 = vpack.c.bf16 %v2958_v25, %v2960_v4  ;;  %v1907_v55 = vld [vmem:[%s3788_s25 + $0x10] sm:$0xff]  ;;  %v4017_v25 = vmax.f32 %v3658_v28, 0.0  ;;  %v2055_v4 = vld [vmem:[%s3828_s4] sm:$0xff] }
 0xa0c   : > { %2770 = vmatpush1.bf16.msra.mxu0 %v2769_v59 }
 0xa0d   : > { %v2962_v17 = vpop.eup %2961  ;;  %v2771_v51 = vpack.c.bf16 %v1809_v49, %v1808_v0  ;;  %v2056_v49 = vld [vmem:[%s3828_s4 + $0x8] sm:$0xff] }
 0xa0e   : > { %v2964_v31 = vpop.eup %2963  ;;  %v1811_v57 = vmul.f32 %v2962_v17, %v3706_v20  ;;  %v1908_v20 = vld [vmem:[%s3788_s25 + $0x18] sm:$0xff]  ;;  %v2811_v0 = vpack.c.bf16 %v2056_v49, %v2055_v4 }
 0xa0f   : > { %2772 = vmatprep.subr.bf16.mxu0 %v2771_v51  ;;  %v1810_v23 = vmul.f32 %v2964_v31, %v3709_v46  ;;  %v2777_v42 = vpack.c.bf16 %v2962_v17, %v2964_v31  ;;  %v2783_v24 = vpack.c.bf16 %v1908_v20, %v1907_v55  ;;  %v1909_v46 = vld [vmem:[%s3788_s25 + $0x20] sm:$0xff]  ;;  %v2058_v55 = vld [vmem:[%s3828_s4 + $0x18] sm:$0xff] }
 0xa10   : > { %2774 = vmatpush1.bf16.msra.mxu0 %v2773_v13  ;;  %v2787_v11 = vpack.c.bf16 %v1910_v37, %v1909_v46  ;;  %v2060_v46 = vld [vmem:[%s3828_s4 + $0x28] sm:$0xff] }
 0xa11   : > { %v2775_v22 = vpack.c.bf16 %v1811_v57, %v1810_v23  ;;  %2784 = vmatprep.subr.bf16.mxu1 %v2783_v24 }
 0xa12   : > { %2786 = vmatpush3.bf16.msra.mxu1 %v2783_v24  ;;  %v2059_v24 = vld [vmem:[%s3828_s4 + $0x20] sm:$0xff] }
 0xa13   : > { %2776 = vmatprep.subr.bf16.mxu0 %v2775_v22  ;;  %2788 = vmatprep.subr.bf16.mxu1 %v2787_v11  ;;  %v2057_v22 = vld [vmem:[%s3828_s4 + $0x10] sm:$0xff]  ;;  %v2819_v37 = vpack.c.bf16 %v2060_v46, %v2059_v24  ;;  %v4022_v46 = vld [vmem:[#allocation17_spill] sm:$0xff] (%p1293_p9) }
 0xa14   : > { %2778 = vmatpush1.bf16.msra.mxu0 %v2777_v42  ;;  %v2815_v20 = vpack.c.bf16 %v2058_v55, %v2057_v22 }
 0xa15   : > { %2812 = vmatprep.subr.bf16.mxu0 %v2811_v0 }
 0xa16   : > { %2790 = vmatpush3.bf16.msra.mxu1 %v2787_v11  ;;  %v2061_v11 = vld [vmem:[%s3828_s4 + $0x30] sm:$0xff] }
 0xa17   : > { %2344 = vmatmul.mubr.msk.f32.vlgmr.msra.gmra.mrb[6].mxu0 %vm949_vm4, %v3312_v16  ;;  %2792 = vmatprep.subr.bf16.mxu1 %v2791_v47  ;;  %v2823_v12 = vpack.c.bf16 %v2062_v38, %v2061_v11 }
 0xa18   : > { %1882 = vmatprep.mubr.f32.mxu0 %v3143_v7  ;;  %v1915_v7 = vld [vmem:[%s3788_s25 + $0x50] sm:$0xff]  ;;  %2814 = vmatpush3.bf16.msra.mxu0 %v2811_v0 }
 0xa19   : > { %v2799_v1 = vpack.c.bf16 %v1916_v10, %v1915_v7  ;;  %2816 = vmatprep.subr.bf16.mxu0 %v2815_v20  ;;  %v2066_v7 = vld [vmem:[%s3828_s4 + $0x58] sm:$0xff] }
 0xa1a   : > { %2794 = vmatpush3.bf16.msra.mxu1 %v2791_v47  ;;  %v2063_v47 = vld [vmem:[%s3828_s4 + $0x40] sm:$0xff]  ;;  %v2831_v10 = vpack.c.bf16 %v2066_v7, %v2065_v14 }
 0xa1b   : > { %2345 = vmatmul.mubr.msk.f32.gmra.mrb[8].mxu0 %vm949_vm4, %v3318_v18  ;;  %2796 = vmatprep.subr.bf16.mxu1 %v2795_v34 }
 0xa1c   : > { %2818 = vmatpush3.bf16.msra.mxu0 %v2815_v20  ;;  %v4019_v20 = vld [vmem:[#allocation33_spill] sm:$0xff] }
 0xa1d   : > { %2820 = vmatprep.subr.bf16.mxu0 %v2819_v37 }
 0xa1e   : > { %2798 = vmatpush3.bf16.msra.mxu1 %v2795_v34  ;;  %v2827_v34 = vpack.c.bf16 %v2064_v6, %v2063_v47 }
 0xa1f   : > { %2800 = vmatprep.subr.bf16.mxu1 %v2799_v1 }
 0xa20   : > { %2822 = vmatpush3.bf16.msra.mxu0 %v2819_v37 }
 0xa21   : > { %2824 = vmatprep.subr.bf16.mxu0 %v2823_v12 }
 0xa22   : > { %2802 = vmatpush3.bf16.msra.mxu1 %v2799_v1  ;;  %v2067_v1 = vld [vmem:[%s3828_s4 + $0x60] sm:$0xff] }
 0xa23   : > { %2804 = vmatprep.subr.bf16.mxu1 %v2803_v45  ;;  %v2835_v21 = vpack.c.bf16 %v2068_v35, %v2067_v1 }
 0xa24   : > { %2826 = vmatpush3.bf16.msra.mxu0 %v2823_v12 }
 0xa25   : > { %2828 = vmatprep.subr.bf16.mxu0 %v2827_v34 }
 0xa26   : > { %2806 = vmatpush3.bf16.msra.mxu1 %v2803_v45  ;;  %v2069_v45 = vld [vmem:[%s3828_s4 + $0x70] sm:$0xff] }
 0xa27   : > { %2808 = vmatprep.subr.bf16.mxu1 %v2807_v26  ;;  %v2839_v32 = vpack.c.bf16 %v2070_v30, %v2069_v45 }
 0xa28   : > { %2830 = vmatpush3.bf16.msra.mxu0 %v2827_v34 }
 0xa29   : > { %2832 = vmatprep.subr.bf16.mxu0 %v2831_v10 }
 0xa2a   : > { %2810 = vmatpush3.bf16.msra.mxu1 %v2807_v26 }
 0xa2c   : > { %2834 = vmatpush3.bf16.msra.mxu0 %v2831_v10 }
 0xa2d   : > { %2836 = vmatprep.subr.bf16.mxu0 %v2835_v21 }
 0xa30   : > { %2838 = vmatpush3.bf16.msra.mxu0 %v2835_v21 }
 0xa31   : > { %2840 = vmatprep.subr.bf16.mxu0 %v2839_v32 }
 0xa34   : > { %2842 = vmatpush3.bf16.msra.mxu0 %v2839_v32 }
 0xaea   : > { %v1878_v61 = vpop.f32.mrb[6].mxu0 }
 0xaeb   : > { %v1889_v63 = vmax.f32 %v1878_v61, 1e-30  ;;  %v1880_v36 = vpop.f32.mrb[7].mxu0 }
 0xaed   : > { %2965 = vrcp.f32 %v1889_v63 }
 0xaee   : > { %v1884_v5 = vpop.f32.mrb[8].mxu0 }
 0xaef   : > { %v1890_v54 = vmax.f32 %v1884_v5, 1e-30  ;;  %v1886_v33 = vpop.f32.mrb[9].mxu0 }
 0xaf1   : > { %2967 = vrcp.f32 %v1890_v54 }
 0xaf7   : > { %v2966_v9 = vpop.eup %2965 }
 0xaf8   : > { %v1893_v29 = vmul.f32 %v2966_v9, %v1889_v63 }
 0xafa   : > { %v1895_v3 = vsub.f32 2.0, %v1893_v29 }
 0xafb   : > { %v2968_v19 = vpop.eup %2967 }
 0xafc   : > { %v1897_v39 = vmul.f32 %v2966_v9, %v1895_v3  ;;  %v1894_v2 = vmul.f32 %v2968_v19, %v1890_v54 }
 0xafe   : > { %v1899_v8 = vmul.f32 %v1897_v39, %v1880_v36  ;;  %v1896_v27 = vsub.f32 2.0, %v1894_v2 }
 0xb00   : > { %v1901_v50 = vadd.f32 %v1899_v8, %v4016_v43  ;;  %v1898_v58 = vmul.f32 %v2968_v19, %v1896_v27 }
 0xb02   : > { %v1900_v59 = vmul.f32 %v1898_v58, %v1886_v33  ;;  %2637 = vmatprep.mubr.f32.mxu1 %v1901_v50  ;;  %v2348_v50 = vld [vmem:[%s2004_s20] ss:$0 sm:$0xff] }
 0xb04   : > { %v1902_v53 = vadd.f32 %v1900_v59, %v4017_v25  ;;  %v2349_v59 = vld [vmem:[%s2006_s0] ss:$0 sm:$0xff] }
 0xb06   : > { %2638 = vmatmul.mubr.f32.vlgmr.msra.gmra.mrb[6].mxu1 %v1902_v53 }
 0xbd9   : > { %v2639_v28 = vpop.f32.mrb[6].mxu1 }
 0xbda   : > { %v1995_v13 = vpop.f32.mrb[7].mxu1  ;;  %v3836_v17 = vadd.f32 %v2639_v28, %v2347_v62 }
 0xbdb   : > { %v3838_v51 = vadd.f32 %v2347_v62, %v1995_v13 }
 0xbdc   : > { %v2009_v23 = vmul.f32 %v3309_v15, %v3836_v17 }
 0xbdd   : > { %v2008_v31 = vmul.f32 %v3309_v15, %v3838_v51 }
 0xbde   : > { %v2017_v42 = vmul.f32 %v2009_v23, %v3836_v17 }
 0xbdf   : > { %2010 = vadd.xlane.f32.xlu0 %v2008_v31  ;;  %v2016_v57 = vmul.f32 %v2008_v31, %v3838_v51  ;;  %v2350_v31 = vld [vmem:[%s2071_s23] ss:$0 sm:$0xff] }
 0xbe1   : > { %2018 = vadd.xlane.f32.xlu1 %v2016_v57 }
 0xbe3   : > { %2012 = vadd.xlane.f32.xlu0 %v2009_v23 }
 0xbe5   : > { %2020 = vadd.xlane.f32.xlu1 %v2017_v42 }
 0xc6c   : > { %v2011_v26 = vpop.xlane.xlu0 %2010 }
 0xc6d   : > { %v2014_v61 = vmul.f32 0.015625, %v2011_v26 }
 0xc6e   : > { %v2019_v63 = vpop.xlane.xlu1 %2018 }
 0xc6f   : > { %v2024_v36 = vmul.f32 %v2014_v61, %v2014_v61  ;;  %v2022_v5 = vmul.f32 0.015625, %v2019_v63  ;;  %v2028_v27 = vsub.f32 %v3838_v51, %v2014_v61 }
 0xc70   : > { %v2013_v54 = vpop.xlane.xlu0 %2012 }
 0xc71   : > { %v2026_v33 = vsub.f32 %v2022_v5, %v2024_v36  ;;  %v2015_v9 = vmul.f32 0.015625, %v2013_v54 }
 0xc72   : > { %v2021_v29 = vpop.xlane.xlu1 %2020 }
 0xc73   : > { %v2030_v3 = vadd.f32 1e-05, %v2026_v33  ;;  %v2025_v19 = vmul.f32 %v2015_v9, %v2015_v9  ;;  %v2023_v39 = vmul.f32 0.015625, %v2021_v29  ;;  %v2029_v25 = vsub.f32 %v3836_v17, %v2015_v9  ;;  %v4018_v17 = vld [vmem:[#allocation32_spill] sm:$0xff] }
 0xc75   : > { %2969 = vrsqrt.f32 %v2030_v3  ;;  %v2027_v2 = vsub.f32 %v2023_v39, %v2025_v19 }
 0xc77   : > { %v2031_v8 = vadd.f32 1e-05, %v2027_v2 }
 0xc79   : > { %2971 = vrsqrt.f32 %v2031_v8 }
 0xc7f   : > { %v2970_v43 = vpop.eup %2969 }
 0xc80   : > { %v2034_v58 = vmul.f32 %v2970_v43, %v2028_v27 }
 0xc82   : > { %v2042_v53 = vmul.f32 %v2348_v50, %v2034_v58 }
 0xc83   : > { %v2972_v4 = vpop.eup %2971 }
 0xc84   : > { %v2035_v49 = vmul.f32 %v2972_v4, %v2029_v25  ;;  %v2050_v0 = vadd.f32 %v2349_v59, %v2042_v53 }
 0xc86   : > { %v2043_v62 = vmul.f32 %v2348_v50, %v2035_v49  ;;  %v2052_v28 = vmax.f32 %v2050_v0, 0.0 }
 0xc88   : > { %v2051_v13 = vadd.f32 %v2349_v59, %v2043_v62  ;;  %2672 = vmatprep.mubr.f32.mxu0 %v2052_v28 }
 0xc8a   : > { %v2053_v51 = vmax.f32 %v2051_v13, 0.0 }
 0xc8c   : > { %2673 = vmatmul.mubr.f32.vlgmr.msra.gmra.mrb[10].mxu0 %v2053_v51 }
 0xd5f   : > { %v2674_v57 = vpop.f32.mrb[10].mxu0  ;;  %1295 = sbr.rel (!%p1293_p9) target bundleno = 1765 (0x6e5), region = 159 }
 0xd60   : > { %v2151_v23 = vadd.f32 %v2674_v57, %v2350_v31  ;;  %v2145_v42 = vpop.f32.mrb[11].mxu0 }
 0xd61   : > { %v2146_v22 = vadd.f32 %v2350_v31, %v2145_v42 }
 0xd62   : > { %v2155_v55 = vadd.f32 %v4018_v17, %v2151_v23  }
 0xd63   : > { %v2154_v24 = vadd.f32 %v4019_v20, %v2146_v22  }
 0xd64   : > { %v4020_v1 = vmov %v2155_v55  ;;  %v2159_v11 = vmul.f32 (%p1293_p9), %v4022_v46, %v2155_v55 }
 0xd65   : > { %v4021_v35 = vmov %v2154_v24  ;;  %v2158_v37 = vmul.f32 (%p1293_p9), %v4022_v46, %v2154_v24 }
 0xd66   :  { %v2167_v12 = vmul.f32 %v2159_v11, %v2155_v55 }
 0xd67   :  { %2160 = vadd.xlane.f32.xlu0 %v2158_v37  ;;  %v2166_v38 = vmul.f32 %v2158_v37, %v2154_v24 }
 0xd69   :  { %2168 = vadd.xlane.f32.xlu1 %v2166_v38 }
 0xd6b   :  { %2162 = vadd.xlane.f32.xlu0 %v2159_v11 }
 0xd6d   :  { %2170 = vadd.xlane.f32.xlu1 %v2167_v12 }
 0xdf4   :  { %v2161_v47 = vpop.xlane.xlu0 %2160 }
 0xdf5   :  { %v2164_v6 = vmul.f32 0.03125, %v2161_v47 }
 0xdf6   :  { %v2169_v14 = vpop.xlane.xlu1 %2168 }
 0xdf7   :  { %v2174_v34 = vmul.f32 %v2164_v6, %v2164_v6  ;;  %v2172_v7 = vmul.f32 0.03125, %v2169_v14  ;;  %v2178_v44 = vsub.f32 %v2154_v24, %v2164_v6 }
 0xdf8   :  { %v2163_v10 = vpop.xlane.xlu0 %2162 }
 0xdf9   :  { %v2176_v35 = vsub.f32 %v2172_v7, %v2174_v34  ;;  %v2165_v21 = vmul.f32 0.03125, %v2163_v10 }
 0xdfa   :  { %v2171_v45 = vpop.xlane.xlu1 %2170 }
 0xdfb   :  { %v2180_v30 = vadd.f32 1e-05, %v2176_v35  ;;  %v2175_v15 = vmul.f32 %v2165_v21, %v2165_v21  ;;  %v2173_v16 = vmul.f32 0.03125, %v2171_v45  ;;  %v2179_v40 = vsub.f32 %v2155_v55, %v2165_v21 }
 0xdfd   :  { %2973 = vrsqrt.f32 %v2180_v30  ;;  %v2177_v18 = vsub.f32 %v2173_v16, %v2175_v15 }
 0xdff   :  { %v2181_v41 = vadd.f32 1e-05, %v2177_v18 }
 0xe01   :  { %2975 = vrsqrt.f32 %v2181_v41 }
 0xe07   :  { %v2974_v48 = vpop.eup %2973 }
 0xe08   :  { %v2184_v56 = vmul.f32 %v2974_v48, %v2178_v44 }
 0xe0a   :  { %v2192_v1 = vmul.f32 %v2351_v52, %v2184_v56 }
 0xe0b   :  { %v2976_v32 = vpop.eup %2975 }
 0xe0c   :  { %v2185_v26 = vmul.f32 %v2976_v32, %v2179_v40  ;;  %v2200_v61 = vadd.f32 %v2352_v60, %v2192_v1 }
 0xe0e   :  { %v2193_v63 = vmul.f32 %v2351_v52, %v2185_v26  ;;  %v2202_v36 = vmax.f32 %v2200_v61, 0.0 }
 0xe10   :  { %v2201_v5 = vadd.f32 %v2352_v60, %v2193_v63  ;;  %2204 = vst [vmem:[#allocation11] sm:$0xff] %v2202_v36 }
 0xe12   :  { %v2203_v54 = vmax.f32 %v2201_v5, 0.0 }
 0xe14   :  { %2205 = vst [vmem:[#allocation11 + $0x8] sm:$0xff] %v2203_v54 }
 0xe15   :  { %3044 = shalt.err (!%p3041_p0)
}
 0xe16   :  { %s3045_s11 = scalar_lea.hbm %s3924_s18, 256 }
 0xe17   :  { %p3046_p1 = scmp.ne.s32.totalorder %s3924_s18, %s3045_s11  ;;  %p3049_p2 = scmp.lt.u32.totalorder %s3045_s11, %s3924_s18 }
 0xe19   :  { %p3051_p3 = pnand %p3049_p2, %p3046_p1 }
 0xe1b   :  { %3054 = shalt.err (!%p3051_p3)
}
 0xe1c   :  { %2217 = dma.vmem_to_hbm [thread:$0]  %s2212_s22, 256, %s3924_s18, [#allocation6], %s3137_s26, %s3137_s26, %s3138_s27  }
 0xe1d   :  { %3097 = dma.done.wait [#allocation6], 256  }
 0xe1e   :  { %3098 = vsyncadd [#allocation6], 4294967040 }
 0xe1f   :  { %2221 = vsyncpa [#allocation5], 1 }
 0xe20   :  { %2222 = vsyncpa [#allocation10], 1 }
 0xe21   :  { %2223 = vsyncpa [#allocation6], 1 }
 0xe22   :  { %2224 = vsyncpa [#allocation7], 1 }

</bundles_post_ra>
